<compile_context>
chip_gen: v7x
topology: tpu7x:2x2x1
jax: 0.10.0
libtpu: 0.0.40
codegen_flags: <defaults>
</compile_context>

<pallas_src>
import math

import jax
import jax.numpy as jnp
from jax.experimental import pallas as pl
from jax.experimental.pallas import tpu as pltpu

# ----------------------- small, module-consistent configuration -----------------------
D_MODEL = 32          # d_model
N_HNMR = 512          # n_hnmr_features (scaled down from 28000)
N_CNMR = 16           # n_cnmr_features
POOL1, C1, K1 = 4, 8, 5      # pool_size_1, out_channels_1, kernel_size_1
POOL2, C2, K2 = 4, 16, 9     # pool_size_2, out_channels_2, kernel_size_2
BATCH = 2

# sequence-length bookkeeping (padding='valid', stride 1 conv, pool stride == pool size)
LC1 = N_HNMR - K1 + 1        # 508  after conv1
LP1 = LC1 // POOL1           # 127  after pool1
LC2 = LP1 - K2 + 1           # 119  after conv2
LP2 = LC2 // POOL2           # 29   after pool2  == h_spectrum_final_seq_len
L_TOTAL = LP2 + N_CNMR       # 45   rows of the concatenated output
VOCAB = N_CNMR + 1           # nn.Embedding(n_Cfeatures + 1, d_model, padding_idx=0)
N_PHASE = N_HNMR // POOL1    # 128  deinterleaved spectrum length per pool-1 phase

assert N_HNMR % POOL1 == 0


# ---------------------------------- fused kernel ---------------------------------------
def _fused_kernel(xq_ref, cidx_ref, w1t_ref, b1_ref, w2t_ref, b2_ref,
                  w3_ref, b3_ref, table_ref, out_ref, h2_ref):
    # xq_ref   : (B, POOL1, N_PHASE)  phase-deinterleaved HNMR spectrum
    # cidx_ref : (B*N_CNMR, 1) int32 prepared (sorted / remapped) CNMR indices
    # out_ref  : (B, L_TOTAL, D_MODEL)
    # h2_ref   : VMEM scratch (LC2, C2) for the conv2 activations (channels-last)
    B = out_ref.shape[0]

    # Small, grid-invariant operands: load once, reuse across the batch loop.
    w1t = w1t_ref[...]            # (C1, K1)
    b1c = b1_ref[...]             # (C1, 1)
    w2t = w2t_ref[...]            # (C2, K2*C1)
    b2r = b2_ref[...]             # (1, C2)
    w3 = w3_ref[...]              # (C2, D_MODEL)
    b3r = b3_ref[...]             # (1, D_MODEL)
    table = table_ref[...]        # (VOCAB, D_MODEL)

    # ---- CNMR embedding for the whole batch: one-hot @ table (padding_idx=0 via zero
    # ---- row in the table).  Hoisted out of the batch loop: a single small matmul. ----
    idx_all = cidx_ref[...]                                        # (B*N_CNMR, 1) int32
    iota_v = jax.lax.broadcasted_iota(jnp.int32, (B * N_CNMR, VOCAB), 1)
    onehot_all = (idx_all == iota_v).astype(jnp.float32)           # (B*N_CNMR, VOCAB)
    cemb_all = jnp.dot(onehot_all, table,
                       preferred_element_type=jnp.float32)         # (B*N_CNMR, D_MODEL)

    for b in range(B):            # B is tiny and static: whole batch in one grid step
        # ---- conv1 + ReLU + max-pool-1 (VPU, channels on sublanes, length on lanes) ----
        # xq[q, m] == spectrum[POOL1 * m + q], so every stride-POOL1 access becomes a
        # contiguous lane access; conv output position 4*m + p uses xq[(p+k)%4, m+(p+k)//4].
        xq = xq_ref[b]                                             # (POOL1, N_PHASE)
        xsh = [xq[o % POOL1:o % POOL1 + 1, o // POOL1:o // POOL1 + LP1]
               for o in range(POOL1 + K1 - 1)]                     # 8 x (1, LP1)
        pooled = None
        for p in range(POOL1):                                     # pool-1 phase
            acc = xsh[p] * w1t[:, 0:1]                             # (C1, LP1) ~ 1 vreg
            for k in range(1, K1):
                acc = acc + xsh[p + k] * w1t[:, k:k + 1]
            pooled = acc if pooled is None else jnp.maximum(pooled, acc)
        h1p = jnp.maximum(pooled + b1c, 0.0)                       # pooled conv1 (C1, LP1)

        # ---- conv2 as a single K = 72 im2col matmul (MXU) ------------------------------
        # windows^T[k*C1 + c, l] = h1p[c, l + k]  -> sublane-tile aligned stacking (free)
        wins = jnp.concatenate([h1p[:, k:k + LC2] for k in range(K2)], axis=0)  # (72, LC2)
        y2t = jnp.dot(w2t, wins, preferred_element_type=jnp.float32)            # (C2, LC2)
        h2_ref[...] = jnp.maximum(y2t.T + b2r, 0.0)                # channels-last (LC2, C2)

        # ---- max-pool-2 via sublane-strided reads of the small scratch -----------------
        h2p = h2_ref[pl.ds(0, LP2, POOL2), :]
        for j in range(1, POOL2):
            h2p = jnp.maximum(h2p, h2_ref[pl.ds(j, LP2, POOL2), :])             # (LP2, C2)

        # ---- post_conv_transform: Linear(C2 -> d_model) --------------------------------
        spec = jnp.dot(h2p, w3, preferred_element_type=jnp.float32) + b3r  # (LP2, D_MODEL)

        # ---- fused torch.cat((spectra_embed, cnmr_embed), dim=1) -----------------------
        out_ref[b, pl.ds(0, LP2), :] = spec
        out_ref[b, pl.ds(LP2, N_CNMR), :] = cemb_all[b * N_CNMR:(b + 1) * N_CNMR, :]


def _fused_call(xq, cidx, w1t, b1c, w2t, b2, w3, b3, table):
    B = xq.shape[0]

    def full_spec(shape):
        return pl.BlockSpec(shape, lambda i, _n=len(shape): (0,) * _n)

    return pl.pallas_call(
        _fused_kernel,
        out_shape=jax.ShapeDtypeStruct((B, L_TOTAL, D_MODEL), jnp.float32),
        grid_spec=pltpu.PrefetchScalarGridSpec(
            num_scalar_prefetch=0,
            grid=(1,),
            in_specs=[
                full_spec((B, POOL1, N_PHASE)),      # deinterleaved spectra
                full_spec((B * N_CNMR, 1)),          # prepared CNMR indices (whole batch)
                full_spec((C1, K1)),                 # w1^T
                full_spec((C1, 1)),                  # b1
                full_spec((C2, K2 * C1)),            # flattened w2
                full_spec((1, C2)),                  # b2
                full_spec((C2, D_MODEL)),            # w3
                full_spec((1, D_MODEL)),             # b3
                full_spec((VOCAB, D_MODEL)),         # embedding table
            ],
            out_specs=full_spec((B, L_TOTAL, D_MODEL)),
            scratch_shapes=[pltpu.VMEM((LC2, C2), jnp.float32)],
        ),
        compiler_params=pltpu.CompilerParams(dimension_semantics=("arbitrary",)),
    )(xq, cidx, w1t, b1c, w2t, b2, w3, b3, table)


# ------------------------------------- glue (JAX) ---------------------------------------
def prepare_cnmr_indices(cnmr):
    """Replicates _embed_cnmr index prep: 1-index active bins, sort, pad with 0."""
    # TODO(synk): torch.sort done in plain JAX (jnp.sort) — no clean Pallas sort primitive.
    idx = jnp.arange(1, N_CNMR + 1, dtype=cnmr.dtype)
    padder = jnp.asarray(2 * N_CNMR, dtype=cnmr.dtype)
    c = cnmr * idx
    c = jnp.where(c == 0, padder, c)
    c = jnp.sort(c, axis=-1)
    c = jnp.where(c == padder, jnp.zeros_like(c), c)
    return c.astype(jnp.int32)


def init_params(key):
    ks = jax.random.split(key, 7)
    w1 = jax.random.normal(ks[0], (K1, C1), jnp.float32) / math.sqrt(K1)
    b1 = jax.random.normal(ks[1], (1, C1), jnp.float32) * 0.01
    w2 = jax.random.normal(ks[2], (K2, C1, C2), jnp.float32) / math.sqrt(K2 * C1)
    b2 = jax.random.normal(ks[3], (1, C2), jnp.float32) * 0.01
    w3 = jax.random.normal(ks[4], (C2, D_MODEL), jnp.float32) / math.sqrt(C2)
    b3 = jax.random.normal(ks[5], (1, D_MODEL), jnp.float32) * 0.01
    table = jax.random.normal(ks[6], (VOCAB, D_MODEL), jnp.float32)
    table = table.at[0].set(0.0)   # padding_idx = 0 -> zero row
    return dict(w1=w1, b1=b1, w2=w2, b2=b2, w3=w3, b3=b3, table=table)


@jax.jit
def conv_embedding_forward(x, params):
    """x: (B, N_HNMR + N_CNMR) float32 -> (B, LP2 + N_CNMR, D_MODEL)."""
    B = x.shape[0]
    spectra = x[:, :N_HNMR]
    cnmr = x[:, N_HNMR:N_HNMR + N_CNMR]
    # Layout plumbing (pure reshapes/transposes), done once in the wrapper:
    #   deinterleave the spectrum by pool-1 phase: xq[b, q, m] = spectra[b, 4*m + q]
    xq = spectra.reshape(B, N_PHASE, POOL1).transpose(0, 2, 1)      # (B, 4, 128)
    cidx = prepare_cnmr_indices(cnmr).reshape(B * N_CNMR, 1)
    w1t = params['w1'].T                                            # (C1, K1)
    b1c = params['b1'].reshape(C1, 1)                               # (C1, 1)
    w2t = params['w2'].transpose(2, 0, 1).reshape(C2, K2 * C1)      # (C2, 72)
    return _fused_call(xq, cidx, w1t, b1c, w2t, params['b2'],
                       params['w3'], params['b3'], params['table'])


# -------------------------------- pure-JAX reference ------------------------------------
def reference_forward(x, params):
    spectra = x[:, :N_HNMR]
    cnmr = x[:, N_HNMR:N_HNMR + N_CNMR]
    w1, b1, w2, b2, w3, b3 = (params[k] for k in ('w1', 'b1', 'w2', 'b2', 'w3', 'b3'))
    B = x.shape[0]
    h = jnp.zeros((B, LC1, C1), jnp.float32)
    for k in range(K1):
        h = h + spectra[:, k:k + LC1, None] * w1[k][None, None, :]
    h = jax.nn.relu(h + b1[None])
    h = h[:, :LP1 * POOL1].reshape(B, LP1, POOL1, C1).max(axis=2)
    h2 = jnp.zeros((B, LC2, C2), jnp.float32)
    for k in range(K2):
        h2 = h2 + jnp.einsum('blc,cd->bld', h[:, k:k + LC2], w2[k])
    h2 = jax.nn.relu(h2 + b2[None])
    h2 = h2[:, :LP2 * POOL2].reshape(B, LP2, POOL2, C2).max(axis=2)
    spec_emb = jnp.einsum('blc,cd->bld', h2, w3) + b3[None]
    cnmr_emb = params['table'][prepare_cnmr_indices(cnmr)]
    return jnp.concatenate([spec_emb, cnmr_emb], axis=1)


# ---------------------------------------- main ------------------------------------------
if __name__ == "__main__":
    key = jax.random.PRNGKey(0)
    kx, kc, kp = jax.random.split(key, 3)
    spectra_in = jax.random.uniform(kx, (BATCH, N_HNMR), jnp.float32)
    cnmr_in = (jax.random.uniform(kc, (BATCH, N_CNMR)) > 0.5).astype(jnp.float32)
    x = jnp.concatenate([spectra_in, cnmr_in], axis=1)   # (BATCH, N_HNMR + N_CNMR)

    params = init_params(kp)

    out = jax.block_until_ready(conv_embedding_forward(x, params))
    ref = jax.block_until_ready(reference_forward(x, params))

    assert out.shape == (BATCH, L_TOTAL, D_MODEL), out.shape
    assert jnp.allclose(out, ref, rtol=1e-4, atol=1e-4), float(jnp.max(jnp.abs(out - ref)))
    print("KERNEL_OK")
</pallas_src>

<mosaic_0001>
module attributes {stable_mosaic.version = 11 : i64} {
  func.func @_fused_kernel(%arg0: i32, %arg1: memref<2x4x128xf32, #tpu.memory_space<vmem>>, %arg2: memref<32x1xi32, #tpu.memory_space<vmem>>, %arg3: memref<8x5xf32, #tpu.memory_space<vmem>>, %arg4: memref<8x1xf32, #tpu.memory_space<vmem>>, %arg5: memref<16x72xf32, #tpu.memory_space<vmem>>, %arg6: memref<1x16xf32, #tpu.memory_space<vmem>>, %arg7: memref<16x32xf32, #tpu.memory_space<vmem>>, %arg8: memref<1x32xf32, #tpu.memory_space<vmem>>, %arg9: memref<17x32xf32, #tpu.memory_space<vmem>>, %arg10: memref<2x45x32xf32, #tpu.memory_space<vmem>>, %arg11: memref<119x16xf32, #tpu.memory_space<vmem>>) attributes {dimension_semantics = [#tpu.dimension_semantics<arbitrary>], iteration_bounds = array<i64: 1>, scalar_prefetch = 0 : i64, scratch_operands = 1 : i64, tpu.core_type = #tpu.core_type<tc>, window_params = [{pipeline_mode = #tpu.pipeline_mode<synchronous>, transform_indices = @transform_0, window_bounds = array<i64: 2, 4, 128>}, {pipeline_mode = #tpu.pipeline_mode<synchronous>, transform_indices = @transform_1, window_bounds = array<i64: 32, 1>}, {pipeline_mode = #tpu.pipeline_mode<synchronous>, transform_indices = @transform_2, window_bounds = array<i64: 8, 5>}, {pipeline_mode = #tpu.pipeline_mode<synchronous>, transform_indices = @transform_3, window_bounds = array<i64: 8, 1>}, {pipeline_mode = #tpu.pipeline_mode<synchronous>, transform_indices = @transform_4, window_bounds = array<i64: 16, 72>}, {pipeline_mode = #tpu.pipeline_mode<synchronous>, transform_indices = @transform_5, window_bounds = array<i64: 1, 16>}, {pipeline_mode = #tpu.pipeline_mode<synchronous>, transform_indices = @transform_6, window_bounds = array<i64: 16, 32>}, {pipeline_mode = #tpu.pipeline_mode<synchronous>, transform_indices = @transform_7, window_bounds = array<i64: 1, 32>}, {pipeline_mode = #tpu.pipeline_mode<synchronous>, transform_indices = @transform_8, window_bounds = array<i64: 17, 32>}, {pipeline_mode = #tpu.pipeline_mode<synchronous>, transform_indices = @transform_9, window_bounds = array<i64: 2, 45, 32>}]} {
    %c0 = arith.constant 0 : index
    %c0_0 = arith.constant 0 : index
    %0 = vector.load %arg3[%c0, %c0_0] : memref<8x5xf32, #tpu.memory_space<vmem>>, vector<8x5xf32>
    %c0_1 = arith.constant 0 : index
    %c0_2 = arith.constant 0 : index
    %1 = vector.load %arg4[%c0_1, %c0_2] : memref<8x1xf32, #tpu.memory_space<vmem>>, vector<8x1xf32>
    %c0_3 = arith.constant 0 : index
    %c0_4 = arith.constant 0 : index
    %2 = vector.load %arg5[%c0_3, %c0_4] : memref<16x72xf32, #tpu.memory_space<vmem>>, vector<16x72xf32>
    %c0_5 = arith.constant 0 : index
    %c0_6 = arith.constant 0 : index
    %3 = vector.load %arg6[%c0_5, %c0_6] : memref<1x16xf32, #tpu.memory_space<vmem>>, vector<1x16xf32>
    %c0_7 = arith.constant 0 : index
    %c0_8 = arith.constant 0 : index
    %4 = vector.load %arg7[%c0_7, %c0_8] : memref<16x32xf32, #tpu.memory_space<vmem>>, vector<16x32xf32>
    %c0_9 = arith.constant 0 : index
    %c0_10 = arith.constant 0 : index
    %5 = vector.load %arg8[%c0_9, %c0_10] : memref<1x32xf32, #tpu.memory_space<vmem>>, vector<1x32xf32>
    %c0_11 = arith.constant 0 : index
    %c0_12 = arith.constant 0 : index
    %6 = vector.load %arg9[%c0_11, %c0_12] : memref<17x32xf32, #tpu.memory_space<vmem>>, vector<17x32xf32>
    %c0_13 = arith.constant 0 : index
    %c0_14 = arith.constant 0 : index
    %7 = vector.load %arg2[%c0_13, %c0_14] : memref<32x1xi32, #tpu.memory_space<vmem>>, vector<32x1xi32>
    %8 = tpu.iota {dimensions = array<i32: 1>} : vector<32x17xi32>
    %9 = vector.broadcast %7 : vector<32x1xi32> to vector<32x17xi32>
    %10 = arith.cmpi eq, %9, %8 : vector<32x17xi32>
    %11 = arith.extui %10 : vector<32x17xi1> to vector<32x17xi32>
    %12 = arith.sitofp %11 : vector<32x17xi32> to vector<32x17xf32>
    %cst = arith.constant dense<0.000000e+00> : vector<32x32xf32>
    %13 = tpu.matmul %12, %6, %cst {dimension_numbers = #tpu.dot_dimension_numbers<[1], [0], [0], [1], [0, 0, 1, 1], [], []>} : vector<32x17xf32>, vector<17x32xf32>, vector<32x32xf32> -> vector<32x32xf32>
    %c0_15 = arith.constant 0 : index
    %c0_16 = arith.constant 0 : index
    %c0_17 = arith.constant 0 : index
    %14 = vector.load %arg1[%c0_15, %c0_16, %c0_17] : memref<2x4x128xf32, #tpu.memory_space<vmem>>, vector<1x4x128xf32>
    %15 = vector.shape_cast %14 : vector<1x4x128xf32> to vector<4x128xf32>
    %16 = vector.extract_strided_slice %15 {offsets = [0, 0], sizes = [1, 127], strides = [1, 1]} : vector<4x128xf32> to vector<1x127xf32>
    %17 = vector.extract_strided_slice %15 {offsets = [1, 0], sizes = [1, 127], strides = [1, 1]} : vector<4x128xf32> to vector<1x127xf32>
    %18 = vector.extract_strided_slice %15 {offsets = [2, 0], sizes = [1, 127], strides = [1, 1]} : vector<4x128xf32> to vector<1x127xf32>
    %19 = vector.extract_strided_slice %15 {offsets = [3, 0], sizes = [1, 127], strides = [1, 1]} : vector<4x128xf32> to vector<1x127xf32>
    %20 = vector.extract_strided_slice %15 {offsets = [0, 1], sizes = [1, 127], strides = [1, 1]} : vector<4x128xf32> to vector<1x127xf32>
    %21 = vector.extract_strided_slice %15 {offsets = [1, 1], sizes = [1, 127], strides = [1, 1]} : vector<4x128xf32> to vector<1x127xf32>
    %22 = vector.extract_strided_slice %15 {offsets = [2, 1], sizes = [1, 127], strides = [1, 1]} : vector<4x128xf32> to vector<1x127xf32>
    %23 = vector.extract_strided_slice %15 {offsets = [3, 1], sizes = [1, 127], strides = [1, 1]} : vector<4x128xf32> to vector<1x127xf32>
    %24 = vector.extract_strided_slice %0 {offsets = [0, 0], sizes = [8, 1], strides = [1, 1]} : vector<8x5xf32> to vector<8x1xf32>
    %25 = vector.broadcast %16 : vector<1x127xf32> to vector<8x127xf32>
    %26 = vector.broadcast %24 : vector<8x1xf32> to vector<8x127xf32>
    %27 = arith.mulf %25, %26 : vector<8x127xf32>
    %28 = vector.extract_strided_slice %0 {offsets = [0, 1], sizes = [8, 1], strides = [1, 1]} : vector<8x5xf32> to vector<8x1xf32>
    %29 = vector.broadcast %17 : vector<1x127xf32> to vector<8x127xf32>
    %30 = vector.broadcast %28 : vector<8x1xf32> to vector<8x127xf32>
    %31 = arith.mulf %29, %30 : vector<8x127xf32>
    %32 = arith.addf %27, %31 : vector<8x127xf32>
    %33 = vector.extract_strided_slice %0 {offsets = [0, 2], sizes = [8, 1], strides = [1, 1]} : vector<8x5xf32> to vector<8x1xf32>
    %34 = vector.broadcast %18 : vector<1x127xf32> to vector<8x127xf32>
    %35 = vector.broadcast %33 : vector<8x1xf32> to vector<8x127xf32>
    %36 = arith.mulf %34, %35 : vector<8x127xf32>
    %37 = arith.addf %32, %36 : vector<8x127xf32>
    %38 = vector.extract_strided_slice %0 {offsets = [0, 3], sizes = [8, 1], strides = [1, 1]} : vector<8x5xf32> to vector<8x1xf32>
    %39 = vector.broadcast %19 : vector<1x127xf32> to vector<8x127xf32>
    %40 = vector.broadcast %38 : vector<8x1xf32> to vector<8x127xf32>
    %41 = arith.mulf %39, %40 : vector<8x127xf32>
    %42 = arith.addf %37, %41 : vector<8x127xf32>
    %43 = vector.extract_strided_slice %0 {offsets = [0, 4], sizes = [8, 1], strides = [1, 1]} : vector<8x5xf32> to vector<8x1xf32>
    %44 = vector.broadcast %20 : vector<1x127xf32> to vector<8x127xf32>
    %45 = vector.broadcast %43 : vector<8x1xf32> to vector<8x127xf32>
    %46 = arith.mulf %44, %45 : vector<8x127xf32>
    %47 = arith.addf %42, %46 : vector<8x127xf32>
    %48 = vector.extract_strided_slice %0 {offsets = [0, 0], sizes = [8, 1], strides = [1, 1]} : vector<8x5xf32> to vector<8x1xf32>
    %49 = vector.broadcast %17 : vector<1x127xf32> to vector<8x127xf32>
    %50 = vector.broadcast %48 : vector<8x1xf32> to vector<8x127xf32>
    %51 = arith.mulf %49, %50 : vector<8x127xf32>
    %52 = vector.extract_strided_slice %0 {offsets = [0, 1], sizes = [8, 1], strides = [1, 1]} : vector<8x5xf32> to vector<8x1xf32>
    %53 = vector.broadcast %18 : vector<1x127xf32> to vector<8x127xf32>
    %54 = vector.broadcast %52 : vector<8x1xf32> to vector<8x127xf32>
    %55 = arith.mulf %53, %54 : vector<8x127xf32>
    %56 = arith.addf %51, %55 : vector<8x127xf32>
    %57 = vector.extract_strided_slice %0 {offsets = [0, 2], sizes = [8, 1], strides = [1, 1]} : vector<8x5xf32> to vector<8x1xf32>
    %58 = vector.broadcast %19 : vector<1x127xf32> to vector<8x127xf32>
    %59 = vector.broadcast %57 : vector<8x1xf32> to vector<8x127xf32>
    %60 = arith.mulf %58, %59 : vector<8x127xf32>
    %61 = arith.addf %56, %60 : vector<8x127xf32>
    %62 = vector.extract_strided_slice %0 {offsets = [0, 3], sizes = [8, 1], strides = [1, 1]} : vector<8x5xf32> to vector<8x1xf32>
    %63 = vector.broadcast %20 : vector<1x127xf32> to vector<8x127xf32>
    %64 = vector.broadcast %62 : vector<8x1xf32> to vector<8x127xf32>
    %65 = arith.mulf %63, %64 : vector<8x127xf32>
    %66 = arith.addf %61, %65 : vector<8x127xf32>
    %67 = vector.extract_strided_slice %0 {offsets = [0, 4], sizes = [8, 1], strides = [1, 1]} : vector<8x5xf32> to vector<8x1xf32>
    %68 = vector.broadcast %21 : vector<1x127xf32> to vector<8x127xf32>
    %69 = vector.broadcast %67 : vector<8x1xf32> to vector<8x127xf32>
    %70 = arith.mulf %68, %69 : vector<8x127xf32>
    %71 = arith.addf %66, %70 : vector<8x127xf32>
    %72 = arith.maximumf %47, %71 : vector<8x127xf32>
    %73 = vector.extract_strided_slice %0 {offsets = [0, 0], sizes = [8, 1], strides = [1, 1]} : vector<8x5xf32> to vector<8x1xf32>
    %74 = vector.broadcast %18 : vector<1x127xf32> to vector<8x127xf32>
    %75 = vector.broadcast %73 : vector<8x1xf32> to vector<8x127xf32>
    %76 = arith.mulf %74, %75 : vector<8x127xf32>
    %77 = vector.extract_strided_slice %0 {offsets = [0, 1], sizes = [8, 1], strides = [1, 1]} : vector<8x5xf32> to vector<8x1xf32>
    %78 = vector.broadcast %19 : vector<1x127xf32> to vector<8x127xf32>
    %79 = vector.broadcast %77 : vector<8x1xf32> to vector<8x127xf32>
    %80 = arith.mulf %78, %79 : vector<8x127xf32>
    %81 = arith.addf %76, %80 : vector<8x127xf32>
    %82 = vector.extract_strided_slice %0 {offsets = [0, 2], sizes = [8, 1], strides = [1, 1]} : vector<8x5xf32> to vector<8x1xf32>
    %83 = vector.broadcast %20 : vector<1x127xf32> to vector<8x127xf32>
    %84 = vector.broadcast %82 : vector<8x1xf32> to vector<8x127xf32>
    %85 = arith.mulf %83, %84 : vector<8x127xf32>
    %86 = arith.addf %81, %85 : vector<8x127xf32>
    %87 = vector.extract_strided_slice %0 {offsets = [0, 3], sizes = [8, 1], strides = [1, 1]} : vector<8x5xf32> to vector<8x1xf32>
    %88 = vector.broadcast %21 : vector<1x127xf32> to vector<8x127xf32>
    %89 = vector.broadcast %87 : vector<8x1xf32> to vector<8x127xf32>
    %90 = arith.mulf %88, %89 : vector<8x127xf32>
    %91 = arith.addf %86, %90 : vector<8x127xf32>
    %92 = vector.extract_strided_slice %0 {offsets = [0, 4], sizes = [8, 1], strides = [1, 1]} : vector<8x5xf32> to vector<8x1xf32>
    %93 = vector.broadcast %22 : vector<1x127xf32> to vector<8x127xf32>
    %94 = vector.broadcast %92 : vector<8x1xf32> to vector<8x127xf32>
    %95 = arith.mulf %93, %94 : vector<8x127xf32>
    %96 = arith.addf %91, %95 : vector<8x127xf32>
    %97 = arith.maximumf %72, %96 : vector<8x127xf32>
    %98 = vector.extract_strided_slice %0 {offsets = [0, 0], sizes = [8, 1], strides = [1, 1]} : vector<8x5xf32> to vector<8x1xf32>
    %99 = vector.broadcast %19 : vector<1x127xf32> to vector<8x127xf32>
    %100 = vector.broadcast %98 : vector<8x1xf32> to vector<8x127xf32>
    %101 = arith.mulf %99, %100 : vector<8x127xf32>
    %102 = vector.extract_strided_slice %0 {offsets = [0, 1], sizes = [8, 1], strides = [1, 1]} : vector<8x5xf32> to vector<8x1xf32>
    %103 = vector.broadcast %20 : vector<1x127xf32> to vector<8x127xf32>
    %104 = vector.broadcast %102 : vector<8x1xf32> to vector<8x127xf32>
    %105 = arith.mulf %103, %104 : vector<8x127xf32>
    %106 = arith.addf %101, %105 : vector<8x127xf32>
    %107 = vector.extract_strided_slice %0 {offsets = [0, 2], sizes = [8, 1], strides = [1, 1]} : vector<8x5xf32> to vector<8x1xf32>
    %108 = vector.broadcast %21 : vector<1x127xf32> to vector<8x127xf32>
    %109 = vector.broadcast %107 : vector<8x1xf32> to vector<8x127xf32>
    %110 = arith.mulf %108, %109 : vector<8x127xf32>
    %111 = arith.addf %106, %110 : vector<8x127xf32>
    %112 = vector.extract_strided_slice %0 {offsets = [0, 3], sizes = [8, 1], strides = [1, 1]} : vector<8x5xf32> to vector<8x1xf32>
    %113 = vector.broadcast %22 : vector<1x127xf32> to vector<8x127xf32>
    %114 = vector.broadcast %112 : vector<8x1xf32> to vector<8x127xf32>
    %115 = arith.mulf %113, %114 : vector<8x127xf32>
    %116 = arith.addf %111, %115 : vector<8x127xf32>
    %117 = vector.extract_strided_slice %0 {offsets = [0, 4], sizes = [8, 1], strides = [1, 1]} : vector<8x5xf32> to vector<8x1xf32>
    %118 = vector.broadcast %23 : vector<1x127xf32> to vector<8x127xf32>
    %119 = vector.broadcast %117 : vector<8x1xf32> to vector<8x127xf32>
    %120 = arith.mulf %118, %119 : vector<8x127xf32>
    %121 = arith.addf %116, %120 : vector<8x127xf32>
    %122 = arith.maximumf %97, %121 : vector<8x127xf32>
    %123 = vector.broadcast %1 : vector<8x1xf32> to vector<8x127xf32>
    %124 = arith.addf %122, %123 : vector<8x127xf32>
    %cst_18 = arith.constant 0.000000e+00 : f32
    %125 = vector.broadcast %cst_18 : f32 to vector<8x127xf32>
    %126 = arith.maximumf %124, %125 : vector<8x127xf32>
    %127 = vector.extract_strided_slice %126 {offsets = [0, 0], sizes = [8, 119], strides = [1, 1]} : vector<8x127xf32> to vector<8x119xf32>
    %128 = vector.extract_strided_slice %126 {offsets = [0, 1], sizes = [8, 119], strides = [1, 1]} : vector<8x127xf32> to vector<8x119xf32>
    %129 = vector.extract_strided_slice %126 {offsets = [0, 2], sizes = [8, 119], strides = [1, 1]} : vector<8x127xf32> to vector<8x119xf32>
    %130 = vector.extract_strided_slice %126 {offsets = [0, 3], sizes = [8, 119], strides = [1, 1]} : vector<8x127xf32> to vector<8x119xf32>
    %131 = vector.extract_strided_slice %126 {offsets = [0, 4], sizes = [8, 119], strides = [1, 1]} : vector<8x127xf32> to vector<8x119xf32>
    %132 = vector.extract_strided_slice %126 {offsets = [0, 5], sizes = [8, 119], strides = [1, 1]} : vector<8x127xf32> to vector<8x119xf32>
    %133 = vector.extract_strided_slice %126 {offsets = [0, 6], sizes = [8, 119], strides = [1, 1]} : vector<8x127xf32> to vector<8x119xf32>
    %134 = vector.extract_strided_slice %126 {offsets = [0, 7], sizes = [8, 119], strides = [1, 1]} : vector<8x127xf32> to vector<8x119xf32>
    %135 = vector.extract_strided_slice %126 {offsets = [0, 8], sizes = [8, 119], strides = [1, 1]} : vector<8x127xf32> to vector<8x119xf32>
    %136 = tpu.concatenate %127, %128, %129, %130, %131, %132, %133, %134, %135 in 0 : vector<8x119xf32>, vector<8x119xf32>, vector<8x119xf32>, vector<8x119xf32>, vector<8x119xf32>, vector<8x119xf32>, vector<8x119xf32>, vector<8x119xf32>, vector<8x119xf32> -> vector<72x119xf32>
    %cst_19 = arith.constant dense<0.000000e+00> : vector<16x119xf32>
    %137 = tpu.matmul %2, %136, %cst_19 {dimension_numbers = #tpu.dot_dimension_numbers<[1], [0], [0], [1], [0, 0, 1, 1], [], []>} : vector<16x72xf32>, vector<72x119xf32>, vector<16x119xf32> -> vector<16x119xf32>
    %138 = tpu.transpose %137, [1, 0] : vector<16x119xf32> -> vector<119x16xf32>
    %139 = vector.broadcast %3 : vector<1x16xf32> to vector<119x16xf32>
    %140 = arith.addf %138, %139 : vector<119x16xf32>
    %cst_20 = arith.constant 0.000000e+00 : f32
    %141 = vector.broadcast %cst_20 : f32 to vector<119x16xf32>
    %142 = arith.maximumf %140, %141 : vector<119x16xf32>
    %c0_21 = arith.constant 0 : index
    %c0_22 = arith.constant 0 : index
    %143 = vector.load %arg11[%c0_21, %c0_22] : memref<119x16xf32, #tpu.memory_space<vmem>>, vector<119x16xf32>
    tpu.vector_store %arg11[%c0_21, %c0_22], %142 {strides = array<i32>} : memref<119x16xf32, #tpu.memory_space<vmem>>, vector<119x16xf32>,
    %c0_23 = arith.constant 0 : index
    %c0_24 = arith.constant 0 : index
    %144 = tpu.strided_load %arg11[%c0_23, %c0_24] {strides = array<i32: 4, 1>} : memref<119x16xf32, #tpu.memory_space<vmem>>, vector<29x16xf32>
    %c1 = arith.constant 1 : index
    %c0_25 = arith.constant 0 : index
    %145 = tpu.strided_load %arg11[%c1, %c0_25] {strides = array<i32: 4, 1>} : memref<119x16xf32, #tpu.memory_space<vmem>>, vector<29x16xf32>
    %146 = arith.maximumf %144, %145 : vector<29x16xf32>
    %c2 = arith.constant 2 : index
    %c0_26 = arith.constant 0 : index
    %147 = tpu.strided_load %arg11[%c2, %c0_26] {strides = array<i32: 4, 1>} : memref<119x16xf32, #tpu.memory_space<vmem>>, vector<29x16xf32>
    %148 = arith.maximumf %146, %147 : vector<29x16xf32>
    %c3 = arith.constant 3 : index
    %c0_27 = arith.constant 0 : index
    %149 = tpu.strided_load %arg11[%c3, %c0_27] {strides = array<i32: 4, 1>} : memref<119x16xf32, #tpu.memory_space<vmem>>, vector<29x16xf32>
    %150 = arith.maximumf %148, %149 : vector<29x16xf32>
    %cst_28 = arith.constant dense<0.000000e+00> : vector<29x32xf32>
    %151 = tpu.matmul %150, %4, %cst_28 {dimension_numbers = #tpu.dot_dimension_numbers<[1], [0], [0], [1], [0, 0, 1, 1], [], []>} : vector<29x16xf32>, vector<16x32xf32>, vector<29x32xf32> -> vector<29x32xf32>
    %152 = vector.broadcast %5 : vector<1x32xf32> to vector<29x32xf32>
    %153 = arith.addf %151, %152 : vector<29x32xf32>
    %c0_29 = arith.constant 0 : index
    %c0_30 = arith.constant 0 : index
    %c0_31 = arith.constant 0 : index
    %154 = vector.load %arg10[%c0_29, %c0_30, %c0_31] : memref<2x45x32xf32, #tpu.memory_space<vmem>>, vector<1x29x32xf32>
    %155 = vector.shape_cast %154 : vector<1x29x32xf32> to vector<29x32xf32>
    %156 = vector.shape_cast %153 : vector<29x32xf32> to vector<1x29x32xf32>
    tpu.vector_store %arg10[%c0_29, %c0_30, %c0_31], %156 {strides = array<i32>} : memref<2x45x32xf32, #tpu.memory_space<vmem>>, vector<1x29x32xf32>,
    %157 = vector.extract_strided_slice %13 {offsets = [0, 0], sizes = [16, 32], strides = [1, 1]} : vector<32x32xf32> to vector<16x32xf32>
    %c0_32 = arith.constant 0 : index
    %c29 = arith.constant 29 : index
    %c0_33 = arith.constant 0 : index
    %158 = vector.load %arg10[%c0_32, %c29, %c0_33] : memref<2x45x32xf32, #tpu.memory_space<vmem>>, vector<1x16x32xf32>
    %159 = vector.shape_cast %158 : vector<1x16x32xf32> to vector<16x32xf32>
    %160 = vector.shape_cast %157 : vector<16x32xf32> to vector<1x16x32xf32>
    tpu.vector_store %arg10[%c0_32, %c29, %c0_33], %160 {strides = array<i32>} : memref<2x45x32xf32, #tpu.memory_space<vmem>>, vector<1x16x32xf32>,
    %c1_34 = arith.constant 1 : index
    %c0_35 = arith.constant 0 : index
    %c0_36 = arith.constant 0 : index
    %161 = vector.load %arg1[%c1_34, %c0_35, %c0_36] : memref<2x4x128xf32, #tpu.memory_space<vmem>>, vector<1x4x128xf32>
    %162 = vector.shape_cast %161 : vector<1x4x128xf32> to vector<4x128xf32>
    %163 = vector.extract_strided_slice %162 {offsets = [0, 0], sizes = [1, 127], strides = [1, 1]} : vector<4x128xf32> to vector<1x127xf32>
    %164 = vector.extract_strided_slice %162 {offsets = [1, 0], sizes = [1, 127], strides = [1, 1]} : vector<4x128xf32> to vector<1x127xf32>
    %165 = vector.extract_strided_slice %162 {offsets = [2, 0], sizes = [1, 127], strides = [1, 1]} : vector<4x128xf32> to vector<1x127xf32>
    %166 = vector.extract_strided_slice %162 {offsets = [3, 0], sizes = [1, 127], strides = [1, 1]} : vector<4x128xf32> to vector<1x127xf32>
    %167 = vector.extract_strided_slice %162 {offsets = [0, 1], sizes = [1, 127], strides = [1, 1]} : vector<4x128xf32> to vector<1x127xf32>
    %168 = vector.extract_strided_slice %162 {offsets = [1, 1], sizes = [1, 127], strides = [1, 1]} : vector<4x128xf32> to vector<1x127xf32>
    %169 = vector.extract_strided_slice %162 {offsets = [2, 1], sizes = [1, 127], strides = [1, 1]} : vector<4x128xf32> to vector<1x127xf32>
    %170 = vector.extract_strided_slice %162 {offsets = [3, 1], sizes = [1, 127], strides = [1, 1]} : vector<4x128xf32> to vector<1x127xf32>
    %171 = vector.extract_strided_slice %0 {offsets = [0, 0], sizes = [8, 1], strides = [1, 1]} : vector<8x5xf32> to vector<8x1xf32>
    %172 = vector.broadcast %163 : vector<1x127xf32> to vector<8x127xf32>
    %173 = vector.broadcast %171 : vector<8x1xf32> to vector<8x127xf32>
    %174 = arith.mulf %172, %173 : vector<8x127xf32>
    %175 = vector.extract_strided_slice %0 {offsets = [0, 1], sizes = [8, 1], strides = [1, 1]} : vector<8x5xf32> to vector<8x1xf32>
    %176 = vector.broadcast %164 : vector<1x127xf32> to vector<8x127xf32>
    %177 = vector.broadcast %175 : vector<8x1xf32> to vector<8x127xf32>
    %178 = arith.mulf %176, %177 : vector<8x127xf32>
    %179 = arith.addf %174, %178 : vector<8x127xf32>
    %180 = vector.extract_strided_slice %0 {offsets = [0, 2], sizes = [8, 1], strides = [1, 1]} : vector<8x5xf32> to vector<8x1xf32>
    %181 = vector.broadcast %165 : vector<1x127xf32> to vector<8x127xf32>
    %182 = vector.broadcast %180 : vector<8x1xf32> to vector<8x127xf32>
    %183 = arith.mulf %181, %182 : vector<8x127xf32>
    %184 = arith.addf %179, %183 : vector<8x127xf32>
    %185 = vector.extract_strided_slice %0 {offsets = [0, 3], sizes = [8, 1], strides = [1, 1]} : vector<8x5xf32> to vector<8x1xf32>
    %186 = vector.broadcast %166 : vector<1x127xf32> to vector<8x127xf32>
    %187 = vector.broadcast %185 : vector<8x1xf32> to vector<8x127xf32>
    %188 = arith.mulf %186, %187 : vector<8x127xf32>
    %189 = arith.addf %184, %188 : vector<8x127xf32>
    %190 = vector.extract_strided_slice %0 {offsets = [0, 4], sizes = [8, 1], strides = [1, 1]} : vector<8x5xf32> to vector<8x1xf32>
    %191 = vector.broadcast %167 : vector<1x127xf32> to vector<8x127xf32>
    %192 = vector.broadcast %190 : vector<8x1xf32> to vector<8x127xf32>
    %193 = arith.mulf %191, %192 : vector<8x127xf32>
    %194 = arith.addf %189, %193 : vector<8x127xf32>
    %195 = vector.extract_strided_slice %0 {offsets = [0, 0], sizes = [8, 1], strides = [1, 1]} : vector<8x5xf32> to vector<8x1xf32>
    %196 = vector.broadcast %164 : vector<1x127xf32> to vector<8x127xf32>
    %197 = vector.broadcast %195 : vector<8x1xf32> to vector<8x127xf32>
    %198 = arith.mulf %196, %197 : vector<8x127xf32>
    %199 = vector.extract_strided_slice %0 {offsets = [0, 1], sizes = [8, 1], strides = [1, 1]} : vector<8x5xf32> to vector<8x1xf32>
    %200 = vector.broadcast %165 : vector<1x127xf32> to vector<8x127xf32>
    %201 = vector.broadcast %199 : vector<8x1xf32> to vector<8x127xf32>
    %202 = arith.mulf %200, %201 : vector<8x127xf32>
    %203 = arith.addf %198, %202 : vector<8x127xf32>
    %204 = vector.extract_strided_slice %0 {offsets = [0, 2], sizes = [8, 1], strides = [1, 1]} : vector<8x5xf32> to vector<8x1xf32>
    %205 = vector.broadcast %166 : vector<1x127xf32> to vector<8x127xf32>
    %206 = vector.broadcast %204 : vector<8x1xf32> to vector<8x127xf32>
    %207 = arith.mulf %205, %206 : vector<8x127xf32>
    %208 = arith.addf %203, %207 : vector<8x127xf32>
    %209 = vector.extract_strided_slice %0 {offsets = [0, 3], sizes = [8, 1], strides = [1, 1]} : vector<8x5xf32> to vector<8x1xf32>
    %210 = vector.broadcast %167 : vector<1x127xf32> to vector<8x127xf32>
    %211 = vector.broadcast %209 : vector<8x1xf32> to vector<8x127xf32>
    %212 = arith.mulf %210, %211 : vector<8x127xf32>
    %213 = arith.addf %208, %212 : vector<8x127xf32>
    %214 = vector.extract_strided_slice %0 {offsets = [0, 4], sizes = [8, 1], strides = [1, 1]} : vector<8x5xf32> to vector<8x1xf32>
    %215 = vector.broadcast %168 : vector<1x127xf32> to vector<8x127xf32>
    %216 = vector.broadcast %214 : vector<8x1xf32> to vector<8x127xf32>
    %217 = arith.mulf %215, %216 : vector<8x127xf32>
    %218 = arith.addf %213, %217 : vector<8x127xf32>
    %219 = arith.maximumf %194, %218 : vector<8x127xf32>
    %220 = vector.extract_strided_slice %0 {offsets = [0, 0], sizes = [8, 1], strides = [1, 1]} : vector<8x5xf32> to vector<8x1xf32>
    %221 = vector.broadcast %165 : vector<1x127xf32> to vector<8x127xf32>
    %222 = vector.broadcast %220 : vector<8x1xf32> to vector<8x127xf32>
    %223 = arith.mulf %221, %222 : vector<8x127xf32>
    %224 = vector.extract_strided_slice %0 {offsets = [0, 1], sizes = [8, 1], strides = [1, 1]} : vector<8x5xf32> to vector<8x1xf32>
    %225 = vector.broadcast %166 : vector<1x127xf32> to vector<8x127xf32>
    %226 = vector.broadcast %224 : vector<8x1xf32> to vector<8x127xf32>
    %227 = arith.mulf %225, %226 : vector<8x127xf32>
    %228 = arith.addf %223, %227 : vector<8x127xf32>
    %229 = vector.extract_strided_slice %0 {offsets = [0, 2], sizes = [8, 1], strides = [1, 1]} : vector<8x5xf32> to vector<8x1xf32>
    %230 = vector.broadcast %167 : vector<1x127xf32> to vector<8x127xf32>
    %231 = vector.broadcast %229 : vector<8x1xf32> to vector<8x127xf32>
    %232 = arith.mulf %230, %231 : vector<8x127xf32>
    %233 = arith.addf %228, %232 : vector<8x127xf32>
    %234 = vector.extract_strided_slice %0 {offsets = [0, 3], sizes = [8, 1], strides = [1, 1]} : vector<8x5xf32> to vector<8x1xf32>
    %235 = vector.broadcast %168 : vector<1x127xf32> to vector<8x127xf32>
    %236 = vector.broadcast %234 : vector<8x1xf32> to vector<8x127xf32>
    %237 = arith.mulf %235, %236 : vector<8x127xf32>
    %238 = arith.addf %233, %237 : vector<8x127xf32>
    %239 = vector.extract_strided_slice %0 {offsets = [0, 4], sizes = [8, 1], strides = [1, 1]} : vector<8x5xf32> to vector<8x1xf32>
    %240 = vector.broadcast %169 : vector<1x127xf32> to vector<8x127xf32>
    %241 = vector.broadcast %239 : vector<8x1xf32> to vector<8x127xf32>
    %242 = arith.mulf %240, %241 : vector<8x127xf32>
    %243 = arith.addf %238, %242 : vector<8x127xf32>
    %244 = arith.maximumf %219, %243 : vector<8x127xf32>
    %245 = vector.extract_strided_slice %0 {offsets = [0, 0], sizes = [8, 1], strides = [1, 1]} : vector<8x5xf32> to vector<8x1xf32>
    %246 = vector.broadcast %166 : vector<1x127xf32> to vector<8x127xf32>
    %247 = vector.broadcast %245 : vector<8x1xf32> to vector<8x127xf32>
    %248 = arith.mulf %246, %247 : vector<8x127xf32>
    %249 = vector.extract_strided_slice %0 {offsets = [0, 1], sizes = [8, 1], strides = [1, 1]} : vector<8x5xf32> to vector<8x1xf32>
    %250 = vector.broadcast %167 : vector<1x127xf32> to vector<8x127xf32>
    %251 = vector.broadcast %249 : vector<8x1xf32> to vector<8x127xf32>
    %252 = arith.mulf %250, %251 : vector<8x127xf32>
    %253 = arith.addf %248, %252 : vector<8x127xf32>
    %254 = vector.extract_strided_slice %0 {offsets = [0, 2], sizes = [8, 1], strides = [1, 1]} : vector<8x5xf32> to vector<8x1xf32>
    %255 = vector.broadcast %168 : vector<1x127xf32> to vector<8x127xf32>
    %256 = vector.broadcast %254 : vector<8x1xf32> to vector<8x127xf32>
    %257 = arith.mulf %255, %256 : vector<8x127xf32>
    %258 = arith.addf %253, %257 : vector<8x127xf32>
    %259 = vector.extract_strided_slice %0 {offsets = [0, 3], sizes = [8, 1], strides = [1, 1]} : vector<8x5xf32> to vector<8x1xf32>
    %260 = vector.broadcast %169 : vector<1x127xf32> to vector<8x127xf32>
    %261 = vector.broadcast %259 : vector<8x1xf32> to vector<8x127xf32>
    %262 = arith.mulf %260, %261 : vector<8x127xf32>
    %263 = arith.addf %258, %262 : vector<8x127xf32>
    %264 = vector.extract_strided_slice %0 {offsets = [0, 4], sizes = [8, 1], strides = [1, 1]} : vector<8x5xf32> to vector<8x1xf32>
    %265 = vector.broadcast %170 : vector<1x127xf32> to vector<8x127xf32>
    %266 = vector.broadcast %264 : vector<8x1xf32> to vector<8x127xf32>
    %267 = arith.mulf %265, %266 : vector<8x127xf32>
    %268 = arith.addf %263, %267 : vector<8x127xf32>
    %269 = arith.maximumf %244, %268 : vector<8x127xf32>
    %270 = vector.broadcast %1 : vector<8x1xf32> to vector<8x127xf32>
    %271 = arith.addf %269, %270 : vector<8x127xf32>
    %cst_37 = arith.constant 0.000000e+00 : f32
    %272 = vector.broadcast %cst_37 : f32 to vector<8x127xf32>
    %273 = arith.maximumf %271, %272 : vector<8x127xf32>
    %274 = vector.extract_strided_slice %273 {offsets = [0, 0], sizes = [8, 119], strides = [1, 1]} : vector<8x127xf32> to vector<8x119xf32>
    %275 = vector.extract_strided_slice %273 {offsets = [0, 1], sizes = [8, 119], strides = [1, 1]} : vector<8x127xf32> to vector<8x119xf32>
    %276 = vector.extract_strided_slice %273 {offsets = [0, 2], sizes = [8, 119], strides = [1, 1]} : vector<8x127xf32> to vector<8x119xf32>
    %277 = vector.extract_strided_slice %273 {offsets = [0, 3], sizes = [8, 119], strides = [1, 1]} : vector<8x127xf32> to vector<8x119xf32>
    %278 = vector.extract_strided_slice %273 {offsets = [0, 4], sizes = [8, 119], strides = [1, 1]} : vector<8x127xf32> to vector<8x119xf32>
    %279 = vector.extract_strided_slice %273 {offsets = [0, 5], sizes = [8, 119], strides = [1, 1]} : vector<8x127xf32> to vector<8x119xf32>
    %280 = vector.extract_strided_slice %273 {offsets = [0, 6], sizes = [8, 119], strides = [1, 1]} : vector<8x127xf32> to vector<8x119xf32>
    %281 = vector.extract_strided_slice %273 {offsets = [0, 7], sizes = [8, 119], strides = [1, 1]} : vector<8x127xf32> to vector<8x119xf32>
    %282 = vector.extract_strided_slice %273 {offsets = [0, 8], sizes = [8, 119], strides = [1, 1]} : vector<8x127xf32> to vector<8x119xf32>
    %283 = tpu.concatenate %274, %275, %276, %277, %278, %279, %280, %281, %282 in 0 : vector<8x119xf32>, vector<8x119xf32>, vector<8x119xf32>, vector<8x119xf32>, vector<8x119xf32>, vector<8x119xf32>, vector<8x119xf32>, vector<8x119xf32>, vector<8x119xf32> -> vector<72x119xf32>
    %cst_38 = arith.constant dense<0.000000e+00> : vector<16x119xf32>
    %284 = tpu.matmul %2, %283, %cst_38 {dimension_numbers = #tpu.dot_dimension_numbers<[1], [0], [0], [1], [0, 0, 1, 1], [], []>} : vector<16x72xf32>, vector<72x119xf32>, vector<16x119xf32> -> vector<16x119xf32>
    %285 = tpu.transpose %284, [1, 0] : vector<16x119xf32> -> vector<119x16xf32>
    %286 = vector.broadcast %3 : vector<1x16xf32> to vector<119x16xf32>
    %287 = arith.addf %285, %286 : vector<119x16xf32>
    %cst_39 = arith.constant 0.000000e+00 : f32
    %288 = vector.broadcast %cst_39 : f32 to vector<119x16xf32>
    %289 = arith.maximumf %287, %288 : vector<119x16xf32>
    %c0_40 = arith.constant 0 : index
    %c0_41 = arith.constant 0 : index
    %290 = vector.load %arg11[%c0_40, %c0_41] : memref<119x16xf32, #tpu.memory_space<vmem>>, vector<119x16xf32>
    tpu.vector_store %arg11[%c0_40, %c0_41], %289 {strides = array<i32>} : memref<119x16xf32, #tpu.memory_space<vmem>>, vector<119x16xf32>,
    %c0_42 = arith.constant 0 : index
    %c0_43 = arith.constant 0 : index
    %291 = tpu.strided_load %arg11[%c0_42, %c0_43] {strides = array<i32: 4, 1>} : memref<119x16xf32, #tpu.memory_space<vmem>>, vector<29x16xf32>
    %c1_44 = arith.constant 1 : index
    %c0_45 = arith.constant 0 : index
    %292 = tpu.strided_load %arg11[%c1_44, %c0_45] {strides = array<i32: 4, 1>} : memref<119x16xf32, #tpu.memory_space<vmem>>, vector<29x16xf32>
    %293 = arith.maximumf %291, %292 : vector<29x16xf32>
    %c2_46 = arith.constant 2 : index
    %c0_47 = arith.constant 0 : index
    %294 = tpu.strided_load %arg11[%c2_46, %c0_47] {strides = array<i32: 4, 1>} : memref<119x16xf32, #tpu.memory_space<vmem>>, vector<29x16xf32>
    %295 = arith.maximumf %293, %294 : vector<29x16xf32>
    %c3_48 = arith.constant 3 : index
    %c0_49 = arith.constant 0 : index
    %296 = tpu.strided_load %arg11[%c3_48, %c0_49] {strides = array<i32: 4, 1>} : memref<119x16xf32, #tpu.memory_space<vmem>>, vector<29x16xf32>
    %297 = arith.maximumf %295, %296 : vector<29x16xf32>
    %cst_50 = arith.constant dense<0.000000e+00> : vector<29x32xf32>
    %298 = tpu.matmul %297, %4, %cst_50 {dimension_numbers = #tpu.dot_dimension_numbers<[1], [0], [0], [1], [0, 0, 1, 1], [], []>} : vector<29x16xf32>, vector<16x32xf32>, vector<29x32xf32> -> vector<29x32xf32>
    %299 = vector.broadcast %5 : vector<1x32xf32> to vector<29x32xf32>
    %300 = arith.addf %298, %299 : vector<29x32xf32>
    %c1_51 = arith.constant 1 : index
    %c0_52 = arith.constant 0 : index
    %c0_53 = arith.constant 0 : index
    %301 = vector.load %arg10[%c1_51, %c0_52, %c0_53] : memref<2x45x32xf32, #tpu.memory_space<vmem>>, vector<1x29x32xf32>
    %302 = vector.shape_cast %301 : vector<1x29x32xf32> to vector<29x32xf32>
    %303 = vector.shape_cast %300 : vector<29x32xf32> to vector<1x29x32xf32>
    tpu.vector_store %arg10[%c1_51, %c0_52, %c0_53], %303 {strides = array<i32>} : memref<2x45x32xf32, #tpu.memory_space<vmem>>, vector<1x29x32xf32>,
    %304 = vector.extract_strided_slice %13 {offsets = [16, 0], sizes = [16, 32], strides = [1, 1]} : vector<32x32xf32> to vector<16x32xf32>
    %c1_54 = arith.constant 1 : index
    %c29_55 = arith.constant 29 : index
    %c0_56 = arith.constant 0 : index
    %305 = vector.load %arg10[%c1_54, %c29_55, %c0_56] : memref<2x45x32xf32, #tpu.memory_space<vmem>>, vector<1x16x32xf32>
    %306 = vector.shape_cast %305 : vector<1x16x32xf32> to vector<16x32xf32>
    %307 = vector.shape_cast %304 : vector<16x32xf32> to vector<1x16x32xf32>
    tpu.vector_store %arg10[%c1_54, %c29_55, %c0_56], %307 {strides = array<i32>} : memref<2x45x32xf32, #tpu.memory_space<vmem>>, vector<1x16x32xf32>,
    return
  }
  func.func @transform_0(%arg0: i32) -> (i32, i32, i32) {
    %c0_i32 = arith.constant 0 : i32
    %c0_i32_0 = arith.constant 0 : i32
    %c0_i32_1 = arith.constant 0 : i32
    %c0_i32_2 = arith.constant 0 : i32
    return %c0_i32, %c0_i32_0, %c0_i32_1 : i32, i32, i32
  }
  func.func @transform_1(%arg0: i32) -> (i32, i32) {
    %c0_i32 = arith.constant 0 : i32
    %c0_i32_0 = arith.constant 0 : i32
    %c0_i32_1 = arith.constant 0 : i32
    return %c0_i32, %c0_i32_0 : i32, i32
  }
  func.func @transform_2(%arg0: i32) -> (i32, i32) {
    %c0_i32 = arith.constant 0 : i32
    %c0_i32_0 = arith.constant 0 : i32
    %c0_i32_1 = arith.constant 0 : i32
    return %c0_i32, %c0_i32_0 : i32, i32
  }
  func.func @transform_3(%arg0: i32) -> (i32, i32) {
    %c0_i32 = arith.constant 0 : i32
    %c0_i32_0 = arith.constant 0 : i32
    %c0_i32_1 = arith.constant 0 : i32
    return %c0_i32, %c0_i32_0 : i32, i32
  }
  func.func @transform_4(%arg0: i32) -> (i32, i32) {
    %c0_i32 = arith.constant 0 : i32
    %c0_i32_0 = arith.constant 0 : i32
    %c0_i32_1 = arith.constant 0 : i32
    return %c0_i32, %c0_i32_0 : i32, i32
  }
  func.func @transform_5(%arg0: i32) -> (i32, i32) {
    %c0_i32 = arith.constant 0 : i32
    %c0_i32_0 = arith.constant 0 : i32
    %c0_i32_1 = arith.constant 0 : i32
    return %c0_i32, %c0_i32_0 : i32, i32
  }
  func.func @transform_6(%arg0: i32) -> (i32, i32) {
    %c0_i32 = arith.constant 0 : i32
    %c0_i32_0 = arith.constant 0 : i32
    %c0_i32_1 = arith.constant 0 : i32
    return %c0_i32, %c0_i32_0 : i32, i32
  }
  func.func @transform_7(%arg0: i32) -> (i32, i32) {
    %c0_i32 = arith.constant 0 : i32
    %c0_i32_0 = arith.constant 0 : i32
    %c0_i32_1 = arith.constant 0 : i32
    return %c0_i32, %c0_i32_0 : i32, i32
  }
  func.func @transform_8(%arg0: i32) -> (i32, i32) {
    %c0_i32 = arith.constant 0 : i32
    %c0_i32_0 = arith.constant 0 : i32
    %c0_i32_1 = arith.constant 0 : i32
    return %c0_i32, %c0_i32_0 : i32, i32
  }
  func.func @transform_9(%arg0: i32) -> (i32, i32, i32) {
    %c0_i32 = arith.constant 0 : i32
    %c0_i32_0 = arith.constant 0 : i32
    %c0_i32_1 = arith.constant 0 : i32
    %c0_i32_2 = arith.constant 0 : i32
    return %c0_i32, %c0_i32_0, %c0_i32_1 : i32, i32, i32
  }
}

</mosaic_0001>

<bundles_post_ra>
// kernel: conv_embedding_forward.1
= control target key start
LH: loop header
LB: loop body
LE: loop exit
PB: predicated region body
PF: predicated region fallthrough
CT: control target
= control target key end

     0   :  { %v1266_v0 = vmov 3   ;;  %v1267_v1 = vmov 1   ;;  %v47_v3 = vlaneseq  ;;  %v1268_v10 = vmov 4   ;;  %s1273_s16 = smov 124   ;;  %s1274_s17 = smov 125   ;;  %s1645_s2 = inlined_call_operand.vmem [shape: f32[8,5], index: 2, kind: input, shape index: {}]   ;;  %s1646_s0 = inlined_call_operand.vmem [shape: f32[2,4,128], index: 0, kind: input, shape index: {}]   ;;  %s1647_s3 = inlined_call_operand.vmem [shape: f32[8,1], index: 3, kind: input, shape index: {}]   ;;  %s1648_s4 = inlined_call_operand.vmem [shape: f32[16,72], index: 4, kind: input, shape index: {}]   ;;  %s1649_s1 = inlined_call_operand.vmem [shape: s32[32,1], index: 1, kind: input, shape index: {}]   ;;  %s1650_s8 = inlined_call_operand.vmem [shape: f32[17,32], index: 8, kind: input, shape index: {}]   ;;  %s1651_s6 = inlined_call_operand.vmem [shape: f32[16,32], index: 6, kind: input, shape index: {}]   ;;  %s1652_s9 = inlined_call_operand.vmem [shape: f32[2,45,32], index: 9, kind: output, shape index: {}]   ;;  %s1653_s5 = inlined_call_operand.vmem [shape: f32[1,16], index: 5, kind: input, shape index: {}]   ;;  %s1654_s7 = inlined_call_operand.vmem [shape: f32[1,32], index: 7, kind: input, shape index: {}]  }
   0x1   :  { %1262 = vset.pattern.permute.xlu1 %v1266_v0  ;;  %1260 = vset.pattern.permute.xlu0 %v1267_v1  ;;  %v32_v2 = vld [vmem:[%s1645_s2] sm:$0xff]  ;;  %v1269_v11 = vmov 2   ;;  %v1270_v16 = vmov 0   ;;  %vm324_vm0 = vcmask 588800   ;;  %s1275_s20 = smov 122   ;;  %s1276_s21 = smov 123  }
   0x2   :  { %211 = vperm.xlu1 %1262, %v32_v2   ;;  %191 = vperm.xlu0 %1260, %v32_v2   ;;  %v177_v4 = vshrl.u32 %v47_v3, 7  ;;  %v1074_v9 = vld [vmem:[%s1646_s0 + $0x4] sm:$0xf]  ;;  %v175_v18 = vld [vmem:[%s1646_s0] sm:$0xf]  ;;  %s1272_s0 = smov 126  }
   0x3   :  { %v33_v17 = vld [vmem:[%s1647_s3] sm:$0xff]  ;;  %s1271_s3 = smov 127   ;;  %s1277_s22 = smov 120   ;;  %vm86_vm1 = vcmask 1040384   ;;  %vm73_vm2 = vcmask 138240   ;;  %vm637_vm7 = vcmask 261120  }
   0x4   :  { %v178_v5 = vsub.s32 0, %v177_v4  ;;  %v188_v6 = vsub.s32 1, %v177_v4  ;;  %v198_v7 = vsub.s32 2, %v177_v4  ;;  %v208_v8 = vsub.s32 3, %v177_v4  ;;  %s1278_s23 = smov 121  }
   0x5   :  { %vm474_vm8 = vcmask 130048   ;;  %vm489_vm9 = vcmask 129024   ;;  %vm641_vm10 = vcmask 258048  }
   0x6   :  { %1263 = vset.pattern.permute.xlu1 %v1268_v10  ;;  %1261 = vset.pattern.permute.xlu0 %v1269_v11  ;;  %v1337_v12 = vrot.slane %v1074_v9, %v178_v5  ;;  %v1339_v13 = vrot.slane %v1074_v9, %v188_v6  ;;  %v1341_v14 = vrot.slane %v1074_v9, %v198_v7 }
   0x7   :  { %217 = vperm.xlu1 %1263, %v32_v2   ;;  %201 = vperm.xlu0 %1261, %v32_v2   ;;  %v667_v15 = vrot.slane %v1074_v9, %v208_v8  ;;  %v179_v19 = vrot.slane %v175_v18, %v178_v5  ;;  %v189_v20 = vrot.slane %v175_v18, %v188_v6 }
   0x8   :  { %v199_v21 = vrot.slane %v175_v18, %v198_v7  ;;  %v1349_v22 = vrot.slane %v175_v18, %v208_v8 }
   0xb   :  { %1264 = vset.pattern.permute.xlu1 %v1270_v16  ;;  %1265 = vset.pattern.permute.xlu0 %v1270_v16 }
   0xc   :  { %182 = vperm.xlu1 %1264, %v32_v2  }
  0x10   :  { %294 = vperm.xlu1 %1264, %v33_v17  }
  0x81   :  { %v212_v23 = vpop.permute.xlu1 %211  ;;  %v192_v24 = vpop.permute.xlu0 %191 }
  0x82   :  { %v231_v25 = vmul.f32 %v212_v23, %v179_v19  ;;  %v227_v26 = vmul.f32 %v199_v21, %v192_v24  ;;  %v245_v27 = vmul.f32 %v1349_v22, %v192_v24  ;;  %v194_v28 = vmul.f32 %v192_v24, %v189_v20 }
  0x83   :  { %v214_v29 = vmul.f32 %v212_v23, %v1349_v22  ;;  %v1355_v30 = vmul.f32 %v1337_v12, %v212_v23  ;;  %v1358_v31 = vmul.f32 %v1337_v12, %v192_v24  ;;  %v1361_v32 = vmul.f32 %v1339_v13, %v212_v23 }
  0x84   :  { %233 = vrot.lane.b32.xlu0 %v231_v25, %s1271_s3  ;;  %v1364_v33 = vmul.f32 %v1341_v14, %v212_v23  ;;  %v695_v34 = vmul.f32 %v667_v15, %v192_v24  ;;  %v677_v35 = vmul.f32 %v1341_v14, %v192_v24  ;;  %v656_v36 = vmul.f32 %v1339_v13, %v192_v24 }
  0x85   :  { %v668_v37 = vmul.f32 %v667_v15, %v212_v23  ;;  %v267_v40 = vmul.f32 %v192_v24, %v179_v19  ;;  %v253_v50 = vmul.f32 %v212_v23, %v189_v20  ;;  %v279_v11 = vmul.f32 %v212_v23, %v199_v21 }
  0x86   :  { %v1368_v38 = vpop.permute.xlu0 %201  ;;  %v218_v39 = vpop.permute.xlu1 %217 }
  0x87   :  { %v247_v41 = vmul.f32 %v1368_v38, %v179_v19  ;;  %v237_v42 = vmul.f32 %v218_v39, %v189_v20  ;;  %v220_v43 = vmul.f32 %v218_v39, %v179_v19  ;;  %v1374_v44 = vmul.f32 %v1337_v12, %v218_v39 }
  0x88   :  { %269 = vrot.lane.b32.xlu0 %v267_v40, %s1271_s3  ;;  %v1377_v45 = vmul.f32 %v1339_v13, %v218_v39  ;;  %v1380_v46 = vmul.f32 %v1341_v14, %v218_v39  ;;  %v1382_v47 = vmul.f32 %v667_v15, %v218_v39  ;;  %v273_v49 = vmul.f32 %v1368_v38, %v189_v20 }
  0x89   :  { %249 = vrot.lane.b32.xlu1 %v247_v41, %s1271_s3  ;;  %v229_v51 = vmul.f32 %v1349_v22, %v1368_v38  ;;  %v204_v54 = vmul.f32 %v1368_v38, %v199_v21  ;;  %v679_v63 = vmul.f32 %v667_v15, %v1368_v38  ;;  %v662_v4 = vmul.f32 %v1341_v14, %v1368_v38 }
  0x8a   :  { %v259_v9 = vmul.f32 %v218_v39, %v199_v21 }
  0x8b   :  { %v183_v48 = vpop.permute.xlu1 %182 }
  0x8c   :  { %239 = vrot.lane.b32.xlu0 %v237_v42, %s1271_s3  ;;  %v226_v52 = vmul.f32 %v189_v20, %v183_v48  ;;  %v244_v53 = vmul.f32 %v199_v21, %v183_v48  ;;  %v185_v55 = vmul.f32 %v183_v48, %v179_v19  ;;  %v694_v56 = vmul.f32 %v1341_v14, %v183_v48 }
  0x8d   :  { %222 = vrot.lane.b32.xlu1 %v220_v43, %s1271_s3  ;;  %v676_v57 = vmul.f32 %v1339_v13, %v183_v48  ;;  %v651_v58 = vmul.f32 %v1337_v12, %v183_v48  ;;  %v1393_v59 = vmul.f32 %v667_v15, %v183_v48  ;;  %v285_v14 = vmul.f32 %v218_v39, %v1349_v22 }
  0x8e   :  { %v228_v60 = vadd.f32 %v227_v26, %v226_v52  ;;  %v246_v61 = vadd.f32 %v245_v27, %v244_v53  ;;  %v195_v62 = vadd.f32 %v194_v28, %v185_v55  ;;  %v1396_v0 = vadd.f32 %v695_v34, %v694_v56 }
  0x8f   :  { %v678_v1 = vadd.f32 %v677_v35, %v676_v57  ;;  %v657_v2 = vadd.f32 %v656_v36, %v651_v58  ;;  %v1410_v17 = vpop.permute.xlu1 %294  ;;  %v266_v23 = vmul.f32 %v1349_v22, %v183_v48  ;;  %v1421_v22 = vld [vmem:[%s1648_s4] sm:$0xff]  ;;  %v697_v48 = vmul.f32 %v1337_v12, %v1368_v38 }
  0x90   :  { %275 = vrot.lane.b32.xlu0 %v273_v49, %s1271_s3  ;;  %v230_v5 = vadd.f32 %v229_v51, %v228_v60  ;;  %v205_v6 = vadd.f32 %v204_v54, %v195_v62  ;;  %1158 = vmatprep.mubr.msk.f32.mxu1 %vm324_vm0, %v1421_v22  ;;  %v723_v12 = vmul.f32 %v1339_v13, %v1368_v38  ;;  %v40_v13 = vld [vmem:[%s1650_s8] sm:$0xff] }
  0x91   :  { %255 = vrot.lane.b32.xlu1 %v253_v50, %s1271_s3  ;;  %v1402_v7 = vadd.f32 %v679_v63, %v678_v1  ;;  %v663_v8 = vadd.f32 %v662_v4, %v657_v2 }
  0x92   :  { %v215_v10 = vadd.f32 %v214_v29, %v205_v6 }
  0x93   :  { %v1404_v15 = vadd.f32 %v668_v37, %v663_v8 }
  0x94   :  { %261 = vrot.lane.b32.xlu0 %v259_v9, %s1271_s3 }
  0x95   :  { %281 = vrot.lane.b32.xlu1 %v279_v11, %s1271_s3 }
  0x98   :  { %287 = vrot.lane.b32.xlu0 %v285_v14, %s1271_s3 }
  0xf6   :  { %v234_v16 = vpop.permute.xlu0 %233 }
  0xf7   :  { %v236_v20 = vadd.f32 %v234_v16, %v230_v5  ;;  %v1475_v5 = vld [vmem:[%s1648_s4 + $0x8] sm:$0xff] }
  0xfa   :  { %v270_v18 = vpop.permute.xlu0 %269 }
  0xfb   :  { %v250_v19 = vpop.permute.xlu1 %249  ;;  %v272_v35 = vadd.f32 %v270_v18, %v266_v23  ;;  %v37_v23 = vld [vmem:[%s1651_s6] sm:$0xff] }
  0xfc   :  { %v252_v27 = vadd.f32 %v250_v19, %v246_v61 }
  0xfe   :  { %v240_v24 = vpop.permute.xlu0 %239 }
  0xff   :  { %v242_v25 = vadd.f32 %v240_v24, %v236_v20  ;;  %v223_v26 = vpop.permute.xlu1 %222 }
 0x100   :  { %v225_v21 = vadd.f32 %v223_v26, %v215_v10 }
 0x102   :  { %v243_v28 = vmax.f32 %v225_v21, %v242_v25  ;;  %v276_v29 = vpop.permute.xlu0 %275 }
 0x103   :  { %v256_v34 = vpop.permute.xlu1 %255  ;;  %v278_v37 = vadd.f32 %v276_v29, %v272_v35 }
 0x104   :  { %v258_v36 = vadd.f32 %v256_v34, %v252_v27 }
 0x106   :  { %v262_v39 = vpop.permute.xlu0 %261 }
 0x107   :  { %v264_v40 = vadd.f32 %v262_v39, %v258_v36  ;;  %v282_v41 = vpop.permute.xlu1 %281  ;;  %v48_v39 = vand.u32 127, %v47_v3 }
 0x108   :  { %v284_v42 = vadd.f32 %v282_v41, %v278_v37 }
 0x109   :  { %v265_v43 = vmax.f32 %v243_v28, %v264_v40 }
 0x10a   :  { %v288_v49 = vpop.permute.xlu0 %287 }
 0x10b   :  { %v290_v50 = vadd.f32 %v288_v49, %v284_v42  ;;  %v1279_v42 = vmov 0.0  }
 0x10d   :  { %v291_v51 = vmax.f32 %v265_v43, %v290_v50 }
 0x10f   :  { %v297_v52 = vadd.f32 %v1410_v17, %v291_v51 }
 0x111   :  { %v298_v53 = vmax.f32 %v297_v52, 0.0 }
 0x113   :  { %303 = vrot.lane.b32.xlu0 %v298_v53, %s1272_s0  ;;  %300 = vrot.lane.b32.xlu1 %v298_v53, %s1271_s3 }
 0x117   :  { %309 = vrot.lane.b32.xlu0 %v298_v53, %s1273_s16  ;;  %306 = vrot.lane.b32.xlu1 %v298_v53, %s1274_s17 }
 0x11b   :  { %315 = vrot.lane.b32.xlu0 %v298_v53, %s1275_s20  ;;  %312 = vrot.lane.b32.xlu1 %v298_v53, %s1276_s21 }
 0x11f   :  { %321 = vrot.lane.b32.xlu0 %v298_v53, %s1277_s22  ;;  %318 = vrot.lane.b32.xlu1 %v298_v53, %s1278_s23 }
 0x123   :  { %699 = vrot.lane.b32.xlu0 %v697_v48, %s1271_s3  ;;  %683 = vrot.lane.b32.xlu1 %v1355_v30, %s1271_s3  ;;  %v43_v30 = vld [vmem:[%s1649_s1] sm:$0xff] }
 0x127   :  { %672 = vrot.lane.b32.xlu0 %v1374_v44, %s1271_s3  ;;  %719 = vrot.lane.b32.xlu1 %v1358_v31, %s1271_s3  ;;  %v44_v31 = vld [vmem:[%s1649_s1 + $0x8] sm:$0xff]  ;;  %v42_v44 = vld [vmem:[%s1650_s8 + $0x10] sm:$0x1] }
 0x12b   :  { %705 = vrot.lane.b32.xlu0 %v1361_v32, %s1271_s3  ;;  %689 = vrot.lane.b32.xlu1 %v1377_v45, %s1271_s3  ;;  %v41_v32 = vld [vmem:[%s1650_s8 + $0x8] sm:$0xff]  ;;  %v46_v45 = vld [vmem:[%s1649_s1 + $0x18] sm:$0xff] }
 0x12c   :  { %v1202_v38 = vpack.c.bf16 %v41_v32, %v40_v13 }
 0x12e   :  { %1203 = vmatprep.subr.bf16.mxu0 %v1202_v38 }
 0x12f   :  { %711 = vrot.lane.b32.xlu0 %v1380_v46, %s1271_s3  ;;  %725 = vrot.lane.b32.xlu1 %v723_v12, %s1271_s3 }
 0x130   :  { %1205 = vmatpush3.bf16.msra.mxu0 %v1202_v38  ;;  %v1525_v38 = vld [vmem:[%s1653_s5] ss:$0 sm:$0xff] }
 0x131   :  { %1132 = vmatprep.subr.msk.mxu0 %vm86_vm1, %v42_v44 }
 0x133   :  { %737 = vrot.lane.b32.xlu0 %v1382_v47, %s1271_s3  ;;  %731 = vrot.lane.b32.xlu1 %v1364_v33, %s1271_s3  ;;  %v45_v33 = vld [vmem:[%s1649_s1 + $0x10] sm:$0xff] }
 0x134   :  { %1133 = vmatpush3.msk.msra.mxu0 %vm86_vm1, %v42_v44 }
 0x137   :  { %50 = vperm.xlu1 %1264, %v43_v30   ;;  %53 = vperm.xlu0 %1265, %v44_v31  }
 0x13b   :  { %56 = vperm.xlu1 %1264, %v45_v33  }
 0x13f   :  { %59 = vperm.xlu1 %1264, %v46_v45  }
 0x185   :  { %v304_v46 = vpop.permute.xlu0 %303  ;;  %v301_v47 = vpop.permute.xlu1 %300 }
 0x186   :  { %v1206_v54 = vpack.c.bf16 %v301_v47, %v298_v53 }
 0x188   :  { %1207 = vmatprep.subr.bf16.mxu1 %v1206_v54 }
 0x189   :  { %v310_v55 = vpop.permute.xlu0 %309  ;;  %1209 = vmatpush3.bf16.msra.mxu1 %v1206_v54  ;;  %v307_v56 = vpop.permute.xlu1 %306 }
 0x18a   :  { %v1210_v57 = vpack.c.bf16 %v307_v56, %v304_v46 }
 0x18c   :  { %1211 = vmatprep.subr.bf16.mxu1 %v1210_v57 }
 0x18d   :  { %v316_v58 = vpop.permute.xlu0 %315  ;;  %1213 = vmatpush3.bf16.msra.mxu1 %v1210_v57  ;;  %v313_v60 = vpop.permute.xlu1 %312 }
 0x18e   :  { %v1214_v61 = vpack.c.bf16 %v313_v60, %v310_v55 }
 0x190   :  { %1215 = vmatprep.subr.bf16.mxu1 %v1214_v61 }
 0x191   :  { %v322_v62 = vpop.permute.xlu0 %321  ;;  %1217 = vmatpush3.bf16.msra.mxu1 %v1214_v61  ;;  %v319_v63 = vpop.permute.xlu1 %318 }
 0x192   :  { %v1218_v1 = vpack.c.bf16 %v319_v63, %v316_v58 }
 0x194   :  { %1219 = vmatprep.subr.bf16.mxu1 %v1218_v1 }
 0x195   :  { %v700_v2 = vpop.permute.xlu0 %699  ;;  %1221 = vmatpush3.bf16.msra.mxu1 %v1218_v1  ;;  %v684_v4 = vpop.permute.xlu1 %683 }
 0x196   :  { %1156 = vmatprep.subr.mxu1 %v322_v62  ;;  %v686_v9 = vadd.f32 %v684_v4, %v1402_v7  ;;  %v702_v14 = vadd.f32 %v700_v2, %v1396_v0  ;;  %v38_v7 = vld [vmem:[%s1651_s6 + $0x8] sm:$0xff] }
 0x197   :  { %v1222_v28 = vpack.c.bf16 %v38_v7, %v37_v23 }
 0x199   :  { %v673_v6 = vpop.permute.xlu0 %672  ;;  %1157 = vmatpush3.msra.mxu1 %v322_v62  ;;  %v720_v8 = vpop.permute.xlu1 %719  ;;  %1223 = vmatprep.subr.bf16.mxu0 %v1222_v28 }
 0x19a   :  { %1159 = vmatmul.mubr.msk.f32.vlgmr.msra.gmra.mrb[0].mxu1 %vm324_vm0, %v1475_v5  ;;  %v675_v16 = vadd.f32 %v673_v6, %v1404_v15  ;;  %v722_v26 = vadd.f32 %v720_v8, %v1393_v59  ;;  %1243 = vmatprep.subr.bf16.mxu1 %v1222_v28 }
 0x19b   :  { %1245 = vmatpush3.bf16.msra.mxu1 %v1222_v28 }
 0x19d   :  { %v706_v10 = vpop.permute.xlu0 %705  ;;  %v690_v11 = vpop.permute.xlu1 %689 }
 0x19e   :  { %v692_v18 = vadd.f32 %v690_v11, %v686_v9  ;;  %v708_v19 = vadd.f32 %v706_v10, %v702_v14 }
 0x1a0   :  { %v693_v20 = vmax.f32 %v675_v16, %v692_v18 }
 0x1a1   :  { %v712_v24 = vpop.permute.xlu0 %711  ;;  %v726_v25 = vpop.permute.xlu1 %725 }
 0x1a2   :  { %v714_v21 = vadd.f32 %v712_v24, %v708_v19  ;;  %v728_v0 = vadd.f32 %v726_v25, %v722_v26 }
 0x1a4   :  { %v715_v27 = vmax.f32 %v693_v20, %v714_v21 }
 0x1a5   :  { %v732_v15 = vpop.permute.xlu1 %731  ;;  %v738_v34 = vpop.permute.xlu0 %737 }
 0x1a6   :  { %v734_v29 = vadd.f32 %v732_v15, %v728_v0 }
 0x1a8   :  { %v740_v35 = vadd.f32 %v738_v34, %v734_v29 }
 0x1aa   :  { %v741_v59 = vmax.f32 %v715_v27, %v740_v35 }
 0x1ac   :  { %v742_v36 = vadd.f32 %v741_v59, %v1410_v17 }
 0x1ae   :  { %v743_v37 = vmax.f32 %v742_v36, 0.0 }
 0x1b0   :  { %745 = vrot.lane.b32.xlu1 %v743_v37, %s1271_s3 }
 0x1b4   :  { %748 = vrot.lane.b32.xlu1 %v743_v37, %s1272_s0 }
 0x1b6   :  { %v51_v40 = vpop.permute.xlu1 %50  ;;  %v54_v41 = vpop.permute.xlu0 %53 }
 0x1b7   :  { %vm61_vm3 = vcmp.eq.s32.totalorder %v51_v40, %v48_v39  ;;  %vm62_vm4 = vcmp.eq.s32.totalorder %v54_v41, %v48_v39 }
 0x1b8   :  { %751 = vrot.lane.b32.xlu1 %v743_v37, %s1274_s17  ;;  %v1058_v43 = vsel %vm62_vm4, 1.0, %v1279_v42  ;;  %v1057_v49 = vsel %vm61_vm3, 1.0, %v1279_v42 }
 0x1b9   :  { %1134 = vmatprep.mubr.msk.f32.mxu0 %vm73_vm2, %v1057_v49 }
 0x1ba   :  { %v57_v17 = vpop.permute.xlu1 %56  ;;  %1135 = vmatmul.mubr.msk.f32.vlgmr.msra.gmra.mrb[0].mxu0 %vm73_vm2, %v1058_v43 }
 0x1bb   :  { %vm63_vm5 = vcmp.eq.s32.totalorder %v57_v17, %v48_v39  ;;  %1225 = vmatpush3.bf16.msra.mxu0 %v1222_v28 }
 0x1bc   :  { %v1059_v3 = vsel %vm63_vm5, 1.0, %v1279_v42  ;;  %754 = vrot.lane.b32.xlu1 %v743_v37, %s1273_s16 }
 0x1bd   :  { %1137 = vmatprep.mubr.msk.f32.mxu0 %vm73_vm2, %v1059_v3 }
 0x1be   :  { %v60_v50 = vpop.permute.xlu1 %59 }
 0x1bf   :  { %vm64_vm6 = vcmp.eq.s32.totalorder %v60_v50, %v48_v39 }
 0x1c0   :  { %v1060_v51 = vsel %vm64_vm6, 1.0, %v1279_v42  ;;  %757 = vrot.lane.b32.xlu1 %v743_v37, %s1276_s21 }
 0x1c1   :  { %1138 = vmatmul.mubr.msk.f32.gmra.mrb[2].mxu0 %vm73_vm2, %v1060_v51 }
 0x1c4   :  { %760 = vrot.lane.b32.xlu1 %v743_v37, %s1275_s20 }
 0x1c8   :  { %763 = vrot.lane.b32.xlu1 %v743_v37, %s1278_s23 }
 0x1cc   :  { %766 = vrot.lane.b32.xlu1 %v743_v37, %s1277_s22 }
 0x222   :  { %v746_v52 = vpop.permute.xlu1 %745 }
 0x223   :  { %v1503_v53 = vpack.c.bf16 %v746_v52, %v743_v37 }
 0x225   :  { %1227 = vmatprep.subr.bf16.mxu0 %v1503_v53 }
 0x226   :  { %v749_v6 = vpop.permute.xlu1 %748 }
 0x22a   :  { %v752_v24 = vpop.permute.xlu1 %751 }
 0x22e   :  { %v755_v28 = vpop.permute.xlu1 %754 }
 0x232   :  { %v758_v59 = vpop.permute.xlu1 %757 }
 0x236   :  { %v761_v52 = vpop.permute.xlu1 %760 }
 0x26d   :  { %v1160_v48 = vpop.f32.mrb[0].mxu1 }
 0x26e   :  { %v397_v12 = vpop.f32.mrb[1].mxu1 }
 0x26f   :  { %406 = vxpose.xlu0.b32.start [1/2] (short) (narrow) %v397_v12, 120 }
 0x273   :  { %407 = vxpose.xlu0.b32.end [2/2] (short) (narrow) %v1160_v48, 120  ;;  %v1230_v48 = vpack.c.bf16 %v752_v24, %v749_v6 }
 0x28d   :  { %v1136_v30 = vpop.f32.mrb[0].mxu0 }
 0x28e   :  { %644 = vst.msk [vmem:[%s1652_s9 + $0x25] sm:$0xff] %vm637_vm7, %v1136_v30  ;;  %v156_v31 = vpop.f32.mrb[1].mxu0 }
 0x28f   :  { %643 = vst.msk [vmem:[%s1652_s9 + $0x1d] sm:$0xff] %vm637_vm7, %v156_v31 }
 0x294   :  { %v1139_v13 = vpop.f32.mrb[2].mxu0 }
 0x295   :  { %1086 = vst.msk [vmem:[%s1652_s9 + $0x55] sm:$0xff] %vm637_vm7, %v1139_v13  ;;  %v166_v32 = vpop.f32.mrb[3].mxu0  ;;  %v1234_v13 = vpack.c.bf16 %v758_v59, %v755_v28 }
 0x296   :  { %1085 = vst.msk [vmem:[%s1652_s9 + $0x4d] sm:$0xff] %vm637_vm7, %v166_v32 }
 0x2ef   :  { %v422_v33 = vpop.trf.xlu0 }
 0x2f0   :  { %v444_v44 = vadd.f32 %v1525_v38, %v422_v33  ;;  %v764_v33 = vpop.permute.xlu1 %763 }
 0x2f2   :  { %v459_v45 = vmax.f32 %v444_v44, 0.0 }
 0x2f3   :  { %v423_v46 = vpop.trf.xlu0 }
 0x2f4   :  { %475 = vst.msk [vmem:[#allocation2] sm:$0xff] %vm474_vm8, %v459_v45  ;;  %v445_v47 = vadd.f32 %v1525_v38, %v423_v46  ;;  %v1238_v46 = vpack.c.bf16 %v764_v33, %v761_v52 }
 0x2f6   :  { %v460_v54 = vmax.f32 %v445_v47, 0.0 }
 0x2f7   :  { %v424_v55 = vpop.trf.xlu0 }
 0x2f8   :  { %476 = vst.msk [vmem:[#allocation2 + $0x8] sm:$0xff] %vm474_vm8, %v460_v54  ;;  %v446_v56 = vadd.f32 %v1525_v38, %v424_v55 }
 0x2fa   :  { %v461_v57 = vmax.f32 %v446_v56, 0.0 }
 0x2fb   :  { %v425_v58 = vpop.trf.xlu0 }
 0x2fc   :  { %477 = vst.msk [vmem:[#allocation2 + $0x10] sm:$0xff] %vm474_vm8, %v461_v57  ;;  %v447_v60 = vadd.f32 %v1525_v38, %v425_v58 }
 0x2fe   :  { %v462_v61 = vmax.f32 %v447_v60, 0.0 }
 0x2ff   :  { %v426_v62 = vpop.trf.xlu0 }
 0x300   :  { %478 = vst.msk [vmem:[#allocation2 + $0x18] sm:$0xff] %vm474_vm8, %v462_v61  ;;  %v448_v63 = vadd.f32 %v1525_v38, %v426_v62  ;;  %v767_v62 = vpop.permute.xlu1 %766 }
 0x302   :  { %v463_v1 = vmax.f32 %v448_v63, 0.0 }
 0x303   :  { %v427_v2 = vpop.trf.xlu0 }
 0x304   :  { %479 = vst.msk [vmem:[#allocation2 + $0x20] sm:$0xff] %vm474_vm8, %v463_v1  ;;  %v449_v4 = vadd.f32 %v1525_v38, %v427_v2 }
 0x306   :  { %v464_v8 = vmax.f32 %v449_v4, 0.0 }
 0x307   :  { %v428_v9 = vpop.trf.xlu0  ;;  %v491_v10 = vld [vmem:[#allocation2] ss:$4 sm:$0xff]  ;;  %v499_v11 = vld [vmem:[#allocation2 + $0x1] ss:$4 sm:$0xff]  ;;  %v511_v18 = vld [vmem:[#allocation2 + $0x2] ss:$4 sm:$0xff] }
 0x308   :  { %480 = vst.msk [vmem:[#allocation2 + $0x28] sm:$0xff] %vm474_vm8, %v464_v8  ;;  %v450_v14 = vadd.f32 %v1525_v38, %v428_v9  ;;  %v506_v16 = vmax.f32 %v491_v10, %v499_v11  ;;  %v523_v26 = vld [vmem:[#allocation2 + $0x3] ss:$4 sm:$0xff] }
 0x30a   :  { %v465_v19 = vmax.f32 %v450_v14, 0.0  ;;  %v518_v20 = vmax.f32 %v506_v16, %v511_v18  ;;  %v1569_v14 = vld [vmem:[%s1654_s7] ss:$0 sm:$0xff] }
 0x30b   :  { %v429_v25 = vpop.trf.xlu0 }
 0x30c   :  { %481 = vst.msk [vmem:[#allocation2 + $0x30] sm:$0xff] %vm474_vm8, %v465_v19  ;;  %v451_v21 = vadd.f32 %v1525_v38, %v429_v25  ;;  %v530_v23 = vmax.f32 %v518_v20, %v523_v26 }
 0x30e   :  { %v466_v7 = vmax.f32 %v451_v21, 0.0  ;;  %1165 = vmatprep.mubr.msk.f32.mxu0 %vm474_vm8, %v530_v23 }
 0x30f   :  { %v430_v27 = vpop.trf.xlu0 }
 0x310   :  { %482 = vst.msk [vmem:[#allocation2 + $0x38] sm:$0xff] %vm474_vm8, %v466_v7  ;;  %v452_v0 = vadd.f32 %v1525_v38, %v430_v27 }
 0x312   :  { %v467_v15 = vmax.f32 %v452_v0, 0.0 }
 0x313   :  { %v431_v29 = vpop.trf.xlu0 }
 0x314   :  { %483 = vst.msk [vmem:[#allocation2 + $0x40] sm:$0xff] %vm474_vm8, %v467_v15  ;;  %v453_v34 = vadd.f32 %v1525_v38, %v431_v29 }
 0x316   :  { %v468_v35 = vmax.f32 %v453_v34, 0.0 }
 0x317   :  { %v432_v36 = vpop.trf.xlu0  ;;  %v493_v37 = vld [vmem:[#allocation2 + $0x20] ss:$4 sm:$0xff]  ;;  %v501_v39 = vld [vmem:[#allocation2 + $0x21] ss:$4 sm:$0xff]  ;;  %v513_v42 = vld [vmem:[#allocation2 + $0x22] ss:$4 sm:$0xff] }
 0x318   :  { %484 = vst.msk [vmem:[#allocation2 + $0x48] sm:$0xff] %vm474_vm8, %v468_v35  ;;  %v454_v40 = vadd.f32 %v1525_v38, %v432_v36  ;;  %v507_v41 = vmax.f32 %v493_v37, %v501_v39  ;;  %v525_v3 = vld [vmem:[#allocation2 + $0x23] ss:$4 sm:$0xff] }
 0x31a   :  { %v469_v43 = vmax.f32 %v454_v40, 0.0  ;;  %v519_v49 = vmax.f32 %v507_v41, %v513_v42 }
 0x31b   :  { %v433_v17 = vpop.trf.xlu0 }
 0x31c   :  { %485 = vst.msk [vmem:[#allocation2 + $0x50] sm:$0xff] %vm474_vm8, %v469_v43  ;;  %v455_v50 = vadd.f32 %v1525_v38, %v433_v17  ;;  %v531_v51 = vmax.f32 %v519_v49, %v525_v3 }
 0x31e   :  { %v470_v12 = vmax.f32 %v455_v50, 0.0  ;;  %1166 = vmatmul.mubr.msk.f32.vlgmr.msra.gmra.mrb[4].mxu0 %vm474_vm8, %v531_v51 }
 0x31f   :  { %1229 = vmatpush3.bf16.msra.mxu0 %v1503_v53  ;;  %v434_v30 = vpop.trf.xlu0 }
 0x320   :  { %486 = vst.msk [vmem:[#allocation2 + $0x58] sm:$0xff] %vm474_vm8, %v470_v12  ;;  %v456_v31 = vadd.f32 %v1525_v38, %v434_v30  ;;  %1231 = vmatprep.subr.bf16.mxu0 %v1230_v48 }
 0x322   :  { %v471_v32 = vmax.f32 %v456_v31, 0.0 }
 0x323   :  { %1233 = vmatpush3.bf16.msra.mxu0 %v1230_v48  ;;  %v435_v44 = vpop.trf.xlu0 }
 0x324   :  { %487 = vst.msk [vmem:[#allocation2 + $0x60] sm:$0xff] %vm474_vm8, %v471_v32  ;;  %v457_v45 = vadd.f32 %v1525_v38, %v435_v44  ;;  %1235 = vmatprep.subr.bf16.mxu0 %v1234_v13 }
 0x326   :  { %v472_v47 = vmax.f32 %v457_v45, 0.0 }
 0x327   :  { %1237 = vmatpush3.bf16.msra.mxu0 %v1234_v13  ;;  %v436_v53 = vpop.trf.xlu0  ;;  %v495_v54 = vld [vmem:[#allocation2 + $0x40] ss:$4 sm:$0xff]  ;;  %v503_v55 = vld [vmem:[#allocation2 + $0x41] ss:$4 sm:$0xff]  ;;  %v515_v58 = vld [vmem:[#allocation2 + $0x42] ss:$4 sm:$0xff] }
 0x328   :  { %488 = vst.msk [vmem:[#allocation2 + $0x68] sm:$0xff] %vm474_vm8, %v472_v47  ;;  %v458_v56 = vadd.f32 %v1525_v38, %v436_v53  ;;  %1239 = vmatprep.subr.bf16.mxu0 %v1238_v46  ;;  %v508_v57 = vmax.f32 %v495_v54, %v503_v55  ;;  %v527_v63 = vld [vmem:[#allocation2 + $0x43] ss:$4 sm:$0xff] }
 0x32a   :  { %v473_v60 = vmax.f32 %v458_v56, 0.0  ;;  %v520_v61 = vmax.f32 %v508_v57, %v515_v58 }
 0x32b   :  { %1241 = vmatpush3.bf16.msra.mxu0 %v1238_v46 }
 0x32c   :  { %490 = vst.msk [vmem:[#allocation2 + $0x70] sm:$0x7f] %vm489_vm9, %v473_v60  ;;  %1187 = vmatprep.subr.mxu0 %v767_v62  ;;  %v532_v1 = vmax.f32 %v520_v61, %v527_v63 }
 0x32e   :  { %1168 = vmatprep.mubr.msk.f32.mxu0 %vm474_vm8, %v532_v1 }
 0x32f   :  { %1188 = vmatpush3.msra.mxu0 %v767_v62 }
 0x333   :  { %v497_v2 = vld [vmem:[#allocation2 + $0x60] ss:$4 sm:$0x1f]  ;;  %v505_v4 = vld [vmem:[#allocation2 + $0x61] ss:$4 sm:$0x1f] }
 0x334   :  { %v509_v6 = vmax.f32 %v497_v2, %v505_v4  ;;  %v517_v8 = vld [vmem:[#allocation2 + $0x62] ss:$4 sm:$0x1f]  ;;  %v529_v10 = vld [vmem:[#allocation2 + $0x63] ss:$4 sm:$0x1f] }
 0x336   :  { %v521_v9 = vmax.f32 %v509_v6, %v517_v8 }
 0x338   :  { %v533_v11 = vmax.f32 %v521_v9, %v529_v10 }
 0x33a   :  { %1169 = vmatmul.mubr.msk.f32.gmra.mrb[6].mxu0 %vm474_vm8, %v533_v11 }
 0x33b   :  { %1189 = vmatprep.mubr.msk.f32.mxu0 %vm324_vm0, %v1421_v22 }
 0x33e   :  { %1190 = vmatmul.mubr.msk.f32.vlgmr.msra.gmra.mrb[8].mxu0 %vm324_vm0, %v1475_v5 }
 0x3f1   :  { %v1167_v16 = vpop.f32.mrb[4].mxu0 }
 0x3f2   :  { %v624_v18 = vadd.f32 %v1167_v16, %v1569_v14  ;;  %v618_v19 = vpop.f32.mrb[5].mxu0 }
 0x3f3   :  { %v619_v20 = vadd.f32 %v1569_v14, %v618_v19 }
 0x3f4   :  { %639 = vst.msk [vmem:[%s1652_s9 + $0x8] sm:$0xff] %vm637_vm7, %v624_v18 }
 0x3f5   :  { %638 = vst.msk [vmem:[%s1652_s9] sm:$0xff] %vm637_vm7, %v619_v20 }
 0x40d   :  { %v1170_v22 = vpop.f32.mrb[6].mxu0 }
 0x40e   :  { %v634_v5 = vadd.f32 %v1170_v22, %v1569_v14  ;;  %v628_v24 = vpop.f32.mrb[7].mxu0 }
 0x40f   :  { %v629_v25 = vadd.f32 %v1569_v14, %v628_v24 }
 0x410   :  { %642 = vst.msk [vmem:[%s1652_s9 + $0x18] sm:$0x1f] %vm641_vm10, %v634_v5 }
 0x411   :  { %640 = vst.msk [vmem:[%s1652_s9 + $0x10] sm:$0xff] %vm637_vm7, %v629_v25  ;;  %v1191_v26 = vpop.f32.mrb[8].mxu0 }
 0x412   :  { %v835_v21 = vpop.f32.mrb[9].mxu0 }
 0x413   :  { %844 = vxpose.xlu1.b32.start [1/2] (short) (narrow) %v835_v21, 120 }
 0x417   :  { %845 = vxpose.xlu1.b32.end [2/2] (short) (narrow) %v1191_v26, 120 }
 0x493   :  { %v860_v23 = vpop.trf.xlu1 }
 0x494   :  { %v876_v7 = vadd.f32 %v1525_v38, %v860_v23 }
 0x496   :  { %v891_v27 = vmax.f32 %v876_v7, 0.0 }
 0x497   :  { %v861_v0 = vpop.trf.xlu1 }
 0x498   :  { %906 = vst.msk [vmem:[#allocation2] sm:$0xff] %vm474_vm8, %v891_v27  ;;  %v877_v28 = vadd.f32 %v1525_v38, %v861_v0 }
 0x49a   :  { %v892_v15 = vmax.f32 %v877_v28, 0.0 }
 0x49b   :  { %v862_v29 = vpop.trf.xlu1 }
 0x49c   :  { %907 = vst.msk [vmem:[#allocation2 + $0x8] sm:$0xff] %vm474_vm8, %v892_v15  ;;  %v878_v34 = vadd.f32 %v1525_v38, %v862_v29 }
 0x49e   :  { %v893_v35 = vmax.f32 %v878_v34, 0.0 }
 0x49f   :  { %v863_v59 = vpop.trf.xlu1 }
 0x4a0   :  { %908 = vst.msk [vmem:[#allocation2 + $0x10] sm:$0xff] %vm474_vm8, %v893_v35  ;;  %v879_v36 = vadd.f32 %v1525_v38, %v863_v59 }
 0x4a2   :  { %v894_v37 = vmax.f32 %v879_v36, 0.0 }
 0x4a3   :  { %v864_v39 = vpop.trf.xlu1 }
 0x4a4   :  { %909 = vst.msk [vmem:[#allocation2 + $0x18] sm:$0xff] %vm474_vm8, %v894_v37  ;;  %v880_v40 = vadd.f32 %v1525_v38, %v864_v39 }
 0x4a6   :  { %v895_v41 = vmax.f32 %v880_v40, 0.0 }
 0x4a7   :  { %v865_v42 = vpop.trf.xlu1 }
 0x4a8   :  { %910 = vst.msk [vmem:[#allocation2 + $0x20] sm:$0xff] %vm474_vm8, %v895_v41  ;;  %v881_v43 = vadd.f32 %v1525_v38, %v865_v42 }
 0x4aa   :  { %v896_v49 = vmax.f32 %v881_v43, 0.0 }
 0x4ab   :  { %v866_v17 = vpop.trf.xlu1  ;;  %v921_v3 = vld [vmem:[#allocation2] ss:$4 sm:$0xff]  ;;  %v925_v50 = vld [vmem:[#allocation2 + $0x1] ss:$4 sm:$0xff]  ;;  %v933_v48 = vld [vmem:[#allocation2 + $0x2] ss:$4 sm:$0xff] }
 0x4ac   :  { %911 = vst.msk [vmem:[#allocation2 + $0x28] sm:$0xff] %vm474_vm8, %v896_v49  ;;  %v882_v51 = vadd.f32 %v1525_v38, %v866_v17  ;;  %v929_v52 = vmax.f32 %v921_v3, %v925_v50  ;;  %v941_v13 = vld [vmem:[#allocation2 + $0x3] ss:$4 sm:$0xff] }
 0x4ae   :  { %v897_v12 = vmax.f32 %v882_v51, 0.0  ;;  %v937_v30 = vmax.f32 %v929_v52, %v933_v48 }
 0x4af   :  { %v867_v31 = vpop.trf.xlu1 }
 0x4b0   :  { %912 = vst.msk [vmem:[#allocation2 + $0x30] sm:$0xff] %vm474_vm8, %v897_v12  ;;  %v883_v32 = vadd.f32 %v1525_v38, %v867_v31  ;;  %v945_v33 = vmax.f32 %v937_v30, %v941_v13 }
 0x4b2   :  { %v898_v44 = vmax.f32 %v883_v32, 0.0  ;;  %1196 = vmatprep.mubr.msk.f32.mxu1 %vm474_vm8, %v945_v33 }
 0x4b3   :  { %v868_v45 = vpop.trf.xlu1 }
 0x4b4   :  { %913 = vst.msk [vmem:[#allocation2 + $0x38] sm:$0xff] %vm474_vm8, %v898_v44  ;;  %v884_v46 = vadd.f32 %v1525_v38, %v868_v45 }
 0x4b6   :  { %v899_v47 = vmax.f32 %v884_v46, 0.0 }
 0x4b7   :  { %v869_v53 = vpop.trf.xlu1 }
 0x4b8   :  { %914 = vst.msk [vmem:[#allocation2 + $0x40] sm:$0xff] %vm474_vm8, %v899_v47  ;;  %v885_v54 = vadd.f32 %v1525_v38, %v869_v53 }
 0x4ba   :  { %v900_v55 = vmax.f32 %v885_v54, 0.0 }
 0x4bb   :  { %v870_v56 = vpop.trf.xlu1  ;;  %v922_v57 = vld [vmem:[#allocation2 + $0x20] ss:$4 sm:$0xff]  ;;  %v926_v58 = vld [vmem:[#allocation2 + $0x21] ss:$4 sm:$0xff]  ;;  %v934_v62 = vld [vmem:[#allocation2 + $0x22] ss:$4 sm:$0xff] }
 0x4bc   :  { %915 = vst.msk [vmem:[#allocation2 + $0x48] sm:$0xff] %vm474_vm8, %v900_v55  ;;  %v886_v60 = vadd.f32 %v1525_v38, %v870_v56  ;;  %v930_v61 = vmax.f32 %v922_v57, %v926_v58  ;;  %v942_v4 = vld [vmem:[#allocation2 + $0x23] ss:$4 sm:$0xff] }
 0x4be   :  { %v901_v63 = vmax.f32 %v886_v60, 0.0  ;;  %v938_v1 = vmax.f32 %v930_v61, %v934_v62 }
 0x4bf   :  { %v871_v2 = vpop.trf.xlu1 }
 0x4c0   :  { %916 = vst.msk [vmem:[#allocation2 + $0x50] sm:$0xff] %vm474_vm8, %v901_v63  ;;  %v887_v6 = vadd.f32 %v1525_v38, %v871_v2  ;;  %v946_v8 = vmax.f32 %v938_v1, %v942_v4 }
 0x4c2   :  { %v902_v9 = vmax.f32 %v887_v6, 0.0  ;;  %1197 = vmatmul.mubr.msk.f32.vlgmr.msra.gmra.mrb[2].mxu1 %vm474_vm8, %v946_v8 }
 0x4c3   :  { %v872_v10 = vpop.trf.xlu1 }
 0x4c4   :  { %917 = vst.msk [vmem:[#allocation2 + $0x58] sm:$0xff] %vm474_vm8, %v902_v9  ;;  %v888_v11 = vadd.f32 %v1525_v38, %v872_v10 }
 0x4c6   :  { %v903_v16 = vmax.f32 %v888_v11, 0.0 }
 0x4c7   :  { %v873_v18 = vpop.trf.xlu1 }
 0x4c8   :  { %918 = vst.msk [vmem:[#allocation2 + $0x60] sm:$0xff] %vm474_vm8, %v903_v16  ;;  %v889_v19 = vadd.f32 %v1525_v38, %v873_v18 }
 0x4ca   :  { %v904_v20 = vmax.f32 %v889_v19, 0.0 }
 0x4cb   :  { %v874_v22 = vpop.trf.xlu1  ;;  %v923_v5 = vld [vmem:[#allocation2 + $0x40] ss:$4 sm:$0xff]  ;;  %v927_v24 = vld [vmem:[#allocation2 + $0x41] ss:$4 sm:$0xff]  ;;  %v935_v21 = vld [vmem:[#allocation2 + $0x42] ss:$4 sm:$0xff] }
 0x4cc   :  { %919 = vst.msk [vmem:[#allocation2 + $0x68] sm:$0xff] %vm474_vm8, %v904_v20  ;;  %v890_v25 = vadd.f32 %v1525_v38, %v874_v22  ;;  %v931_v26 = vmax.f32 %v923_v5, %v927_v24  ;;  %v943_v27 = vld [vmem:[#allocation2 + $0x43] ss:$4 sm:$0xff] }
 0x4ce   :  { %v905_v23 = vmax.f32 %v890_v25, 0.0  ;;  %v939_v7 = vmax.f32 %v931_v26, %v935_v21 }
 0x4d0   :  { %920 = vst.msk [vmem:[#allocation2 + $0x70] sm:$0x7f] %vm489_vm9, %v905_v23  ;;  %v947_v0 = vmax.f32 %v939_v7, %v943_v27 }
 0x4d2   :  { %1199 = vmatprep.mubr.msk.f32.mxu1 %vm474_vm8, %v947_v0 }
 0x4d7   :  { %v924_v28 = vld [vmem:[#allocation2 + $0x60] ss:$4 sm:$0x1f]  ;;  %v928_v15 = vld [vmem:[#allocation2 + $0x61] ss:$4 sm:$0x1f] }
 0x4d8   :  { %v932_v29 = vmax.f32 %v924_v28, %v928_v15  ;;  %v936_v34 = vld [vmem:[#allocation2 + $0x62] ss:$4 sm:$0x1f]  ;;  %v944_v59 = vld [vmem:[#allocation2 + $0x63] ss:$4 sm:$0x1f] }
 0x4da   :  { %v940_v35 = vmax.f32 %v932_v29, %v936_v34 }
 0x4dc   :  { %v948_v36 = vmax.f32 %v940_v35, %v944_v59 }
 0x4de   :  { %1200 = vmatmul.mubr.msk.f32.gmra.mrb[4].mxu1 %vm474_vm8, %v948_v36 }
 0x595   :  { %v1198_v38 = vpop.f32.mrb[2].mxu1 }
 0x596   :  { %v1033_v37 = vadd.f32 %v1198_v38, %v1569_v14  ;;  %v1027_v39 = vpop.f32.mrb[3].mxu1 }
 0x597   :  { %v1028_v40 = vadd.f32 %v1569_v14, %v1027_v39 }
 0x598   :  { %1082 = vst.msk [vmem:[%s1652_s9 + $0x38] sm:$0xff] %vm637_vm7, %v1033_v37 }
 0x599   :  { %1081 = vst.msk [vmem:[%s1652_s9 + $0x30] sm:$0xff] %vm637_vm7, %v1028_v40 }
 0x5b1   :  { %v1201_v41 = vpop.f32.mrb[4].mxu1 }
 0x5b2   :  { %v1043_v42 = vadd.f32 %v1201_v41, %v1569_v14  ;;  %v1037_v43 = vpop.f32.mrb[5].mxu1 }
 0x5b3   :  { %v1038_v49 = vadd.f32 %v1569_v14, %v1037_v43 }
 0x5b4   :  { %1084 = vst.msk [vmem:[%s1652_s9 + $0x48] sm:$0x1f] %vm641_vm10, %v1043_v42 }
 0x5b5   :  { %1083 = vst.msk [vmem:[%s1652_s9 + $0x40] sm:$0xff] %vm637_vm7, %v1038_v49 }

</bundles_post_ra>
